<compile_context>
chip_gen: v6e
topology: v6e:2x2x1
jax: 0.10.0
libtpu: 0.0.40
codegen_flags: <defaults>
</compile_context>

<pallas_src>
import functools
import math

import jax
import jax.numpy as jnp
import numpy as np
from jax import lax
from jax.experimental import pallas as pl
from jax.experimental.pallas import tpu as pltpu


def _block_kernel(x_ref, g1_ref, b1_ref, wq_ref, wkv_ref, wpr_ref, bproj_ref,
                  g2_ref, b2_ref, wfc1_ref, bfc1_ref, wfc2_ref, bfc2_ref,
                  o_ref, k_sc, v_sc, *, num_heads, head_dim, tile_n, eps):
    h, d = num_heads, head_dim
    C = h * d
    i = pl.program_id(1)          # query-tile index within this batch element

    def layernorm(y, g, b):
        mu = jnp.mean(y, axis=-1, keepdims=True)
        var = jnp.mean((y - mu) ** 2, axis=-1, keepdims=True)
        return (y - mu) * lax.rsqrt(var + eps) * g + b

    def split_heads(y2d):         # (rows, h*d) f32 -> (h, rows, d) bf16
        y = y2d.astype(jnp.bfloat16)
        return jnp.stack([y[:, j * d:(j + 1) * d] for j in range(h)], axis=0)

    g1 = g1_ref[...].astype(jnp.float32)
    b1 = b1_ref[...].astype(jnp.float32)

    # ---- once per batch element: K/V for the whole sequence -> VMEM scratch --
    @pl.when(i == 0)
    def _():
        xn_all = layernorm(x_ref[0].astype(jnp.float32), g1, b1)
        kv = jnp.dot(xn_all.astype(jnp.bfloat16), wkv_ref[...],
                     preferred_element_type=jnp.float32)          # (N, 2C) f32
        k_sc[...] = split_heads(kv[:, :C])                        # (h, N, d) bf16
        v_sc[...] = split_heads(kv[:, C:])                        # (h, N, d) bf16

    # ---- this query tile ----------------------------------------------------
    row0 = pl.multiple_of(i * tile_n, tile_n)
    x_t = x_ref[0, pl.ds(row0, tile_n), :].astype(jnp.float32)    # (tn, C)

    # LayerNorm 1 + Q projection (attention scale already folded into wq).
    xn_t = layernorm(x_t, g1, b1)
    q2 = jnp.dot(xn_t.astype(jnp.bfloat16), wq_ref[...],
                 preferred_element_type=jnp.float32)              # (tn, C)
    q3 = split_heads(q2)                                          # (h, tn, d)

    # Batched multi-head attention (heads = batch dim, full keys from scratch).
    s = jnp.einsum('hnd,hmd->hnm', q3, k_sc[...],
                   preferred_element_type=jnp.float32)            # (h, tn, N)
    s = s - jnp.max(s, axis=-1, keepdims=True)
    p = jnp.exp(s)
    inv = pl.reciprocal(jnp.sum(p, axis=-1, keepdims=True), approx=True)
    o3 = jnp.einsum('hnm,hmd->hnd', p.astype(jnp.bfloat16), v_sc[...],
                    preferred_element_type=jnp.float32)           # (h, tn, d)
    o3 = o3 * inv                                                 # normalize the small tensor

    # Output projection: per-head (tn,d)@(d,C), summed over heads (no concat).
    proj = jnp.einsum('hnd,hdc->hnc', o3.astype(jnp.bfloat16), wpr_ref[...],
                      preferred_element_type=jnp.float32).sum(axis=0)  # (tn, C)
    x1 = x_t + proj + bproj_ref[...].astype(jnp.float32)

    # LayerNorm 2 + MLP (fc1 -> exact GELU -> fc2) + residual.
    xn2 = layernorm(x1, g2_ref[...].astype(jnp.float32),
                    b2_ref[...].astype(jnp.float32))
    h1 = jnp.dot(xn2.astype(jnp.bfloat16), wfc1_ref[...],
                 preferred_element_type=jnp.float32) + bfc1_ref[...].astype(jnp.float32)
    h1 = 0.5 * h1 * (1.0 + lax.erf(h1 * (1.0 / math.sqrt(2.0))))
    h2 = jnp.dot(h1.astype(jnp.bfloat16), wfc2_ref[...],
                 preferred_element_type=jnp.float32) + bfc2_ref[...].astype(jnp.float32)

    o_ref[0] = (x1 + h2).astype(o_ref.dtype)


def prepare_block_params(params, *, num_heads):
    """One-time host-side parameter transform for the kernel:
    bf16 weights, attention scale folded into Q, per-head proj layout."""
    C = params["wqkv"].shape[0]
    assert C % num_heads == 0
    d = C // num_heads
    scale = d ** (-0.5)
    return {
        "g1": params["g1"].astype(jnp.float32),
        "b1": params["b1"].astype(jnp.float32),
        "wq": (params["wqkv"][:, :C] * scale).astype(jnp.bfloat16),   # (C, C)
        "wkv": params["wqkv"][:, C:].astype(jnp.bfloat16),            # (C, 2C)
        "wproj_r": params["wproj"].reshape(num_heads, d, C).astype(jnp.bfloat16),
        "bproj": params["bproj"].astype(jnp.float32),
        "g2": params["g2"].astype(jnp.float32),
        "b2": params["b2"].astype(jnp.float32),
        "wfc1": params["wfc1"].astype(jnp.bfloat16),
        "bfc1": params["bfc1"].astype(jnp.float32),
        "wfc2": params["wfc2"].astype(jnp.bfloat16),
        "bfc2": params["bfc2"].astype(jnp.float32),
    }


def vit_block_pallas(x, kp, *, num_heads, tile_n=None, eps=1e-5):
    B, N, C = x.shape
    assert C % num_heads == 0
    d = C // num_heads
    H = kp["wfc1"].shape[1]
    if tile_n is None:
        # Largest divisor of N that is <= 256 and a multiple of 8 (or N itself).
        tile_n = N
        if N > 256:
            for cand in range(256, 7, -8):
                if N % cand == 0:
                    tile_n = cand
                    break
    assert N % tile_n == 0 and (tile_n == N or tile_n % 8 == 0)
    nq = N // tile_n

    kernel = functools.partial(_block_kernel, num_heads=num_heads,
                               head_dim=d, tile_n=tile_n, eps=eps)

    def const(shape):   # resident weights: constant block index across the grid
        return pl.BlockSpec(shape, lambda b, i: (0,) * len(shape))

    grid_spec = pltpu.PrefetchScalarGridSpec(
        num_scalar_prefetch=0,
        grid=(B, nq),
        in_specs=[
            pl.BlockSpec((1, N, C), lambda b, i: (b, 0, 0)),   # x (full seq per batch)
            const((1, C)), const((1, C)),                      # norm1 gamma/beta
            const((C, C)),                                     # Wq (scale folded)
            const((C, 2 * C)),                                 # Wkv
            const((num_heads, d, C)),                          # Wproj, per-head
            const((1, C)),                                     # bproj
            const((1, C)), const((1, C)),                      # norm2 gamma/beta
            const((C, H)), const((1, H)),                      # Wfc1, bfc1
            const((H, C)), const((1, C)),                      # Wfc2, bfc2
        ],
        out_specs=pl.BlockSpec((1, tile_n, C), lambda b, i: (b, i, 0)),
        scratch_shapes=[pltpu.VMEM((num_heads, N, d), jnp.bfloat16),   # K cache
                        pltpu.VMEM((num_heads, N, d), jnp.bfloat16)],  # V cache
    )
    return pl.pallas_call(
        kernel,
        out_shape=jax.ShapeDtypeStruct((B, N, C), x.dtype),
        grid_spec=grid_spec,
        compiler_params=pltpu.CompilerParams(
            dimension_semantics=("parallel", "arbitrary"),
            vmem_limit_bytes=48 * 1024 * 1024),
    )(x, kp["g1"], kp["b1"], kp["wq"], kp["wkv"], kp["wproj_r"], kp["bproj"],
      kp["g2"], kp["b2"], kp["wfc1"], kp["bfc1"], kp["wfc2"], kp["bfc2"])


def vit_block_ref(x, params, *, num_heads):
    """Pure-JAX f32 reference mirroring the PyTorch Block forward."""
    B, N, C = x.shape
    head_dim = C // num_heads
    scale = head_dim ** (-0.5)

    def ln(y, g, b):
        mu = y.mean(-1, keepdims=True)
        var = ((y - mu) ** 2).mean(-1, keepdims=True)
        return (y - mu) / jnp.sqrt(var + 1e-5) * g + b

    xn = ln(x, params["g1"], params["b1"])
    qkv = xn @ params["wqkv"]
    qkv = qkv.reshape(B, N, 3, num_heads, head_dim).transpose(2, 0, 3, 1, 4)
    q, k, v = qkv[0] * scale, qkv[1], qkv[2]
    attn = jax.nn.softmax(q @ k.transpose(0, 1, 3, 2), axis=-1)
    out = (attn @ v).transpose(0, 2, 1, 3).reshape(B, N, C)
    x = x + out @ params["wproj"] + params["bproj"]
    xn2 = ln(x, params["g2"], params["b2"])
    h = jax.nn.gelu(xn2 @ params["wfc1"] + params["bfc1"], approximate=False)
    x = x + h @ params["wfc2"] + params["bfc2"]
    return x


if __name__ == "__main__":
    B, N, C = 2, 16, 32
    num_heads = 4
    mlp_ratio = 4.0
    H = int(C * mlp_ratio)

    key = jax.random.PRNGKey(0)
    ks = jax.random.split(key, 8)
    params = {
        "g1": jnp.ones((1, C), jnp.float32),
        "b1": jnp.zeros((1, C), jnp.float32),
        "wqkv": 0.02 * jax.random.normal(ks[0], (C, 3 * C), jnp.float32),
        "wproj": 0.02 * jax.random.normal(ks[1], (C, C), jnp.float32),
        "bproj": 0.02 * jax.random.normal(ks[2], (1, C), jnp.float32),
        "g2": jnp.ones((1, C), jnp.float32),
        "b2": jnp.zeros((1, C), jnp.float32),
        "wfc1": 0.02 * jax.random.normal(ks[3], (C, H), jnp.float32),
        "bfc1": 0.02 * jax.random.normal(ks[4], (1, H), jnp.float32),
        "wfc2": 0.02 * jax.random.normal(ks[5], (H, C), jnp.float32),
        "bfc2": 0.02 * jax.random.normal(ks[6], (1, C), jnp.float32),
    }
    x = jax.random.normal(ks[7], (B, N, C), jnp.float32)

    kparams = prepare_block_params(params, num_heads=num_heads)
    out = vit_block_pallas(x, kparams, num_heads=num_heads, tile_n=8)
    out = jax.block_until_ready(out)

    ref = vit_block_ref(x, params, num_heads=num_heads)
    # Tolerance accounts for bf16 MXU operands + approx reciprocal vs. the
    # pure-f32 reference; observed error is ~1e-3 abs at these scales.
    np.testing.assert_allclose(np.asarray(out, np.float32), np.asarray(ref),
                               rtol=1e-2, atol=1e-2)
    print("KERNEL_OK")
</pallas_src>

<mosaic_0001>
module attributes {stable_mosaic.version = 11 : i64} {
  func.func @_block_kernel(%arg0: i32, %arg1: i32, %arg2: memref<1x16x32xf32, #tpu.memory_space<vmem>>, %arg3: memref<1x32xf32, #tpu.memory_space<vmem>>, %arg4: memref<1x32xf32, #tpu.memory_space<vmem>>, %arg5: memref<32x32xbf16, #tpu.memory_space<vmem>>, %arg6: memref<32x64xbf16, #tpu.memory_space<vmem>>, %arg7: memref<4x8x32xbf16, #tpu.memory_space<vmem>>, %arg8: memref<1x32xf32, #tpu.memory_space<vmem>>, %arg9: memref<1x32xf32, #tpu.memory_space<vmem>>, %arg10: memref<1x32xf32, #tpu.memory_space<vmem>>, %arg11: memref<32x128xbf16, #tpu.memory_space<vmem>>, %arg12: memref<1x128xf32, #tpu.memory_space<vmem>>, %arg13: memref<128x32xbf16, #tpu.memory_space<vmem>>, %arg14: memref<1x32xf32, #tpu.memory_space<vmem>>, %arg15: memref<1x8x32xf32, #tpu.memory_space<vmem>>, %arg16: memref<4x16x8xbf16, #tpu.memory_space<vmem>>, %arg17: memref<4x16x8xbf16, #tpu.memory_space<vmem>>) attributes {dimension_semantics = [#tpu.dimension_semantics<parallel>, #tpu.dimension_semantics<arbitrary>], iteration_bounds = array<i64: 2, 2>, scalar_prefetch = 0 : i64, scratch_operands = 2 : i64, tpu.core_type = #tpu.core_type<tc>, window_params = [{transform_indices = @transform_0, window_bounds = array<i64: 1, 16, 32>}, {pipeline_mode = #tpu.pipeline_mode<synchronous>, transform_indices = @transform_1, window_bounds = array<i64: 1, 32>}, {pipeline_mode = #tpu.pipeline_mode<synchronous>, transform_indices = @transform_2, window_bounds = array<i64: 1, 32>}, {pipeline_mode = #tpu.pipeline_mode<synchronous>, transform_indices = @transform_3, window_bounds = array<i64: 32, 32>}, {pipeline_mode = #tpu.pipeline_mode<synchronous>, transform_indices = @transform_4, window_bounds = array<i64: 32, 64>}, {pipeline_mode = #tpu.pipeline_mode<synchronous>, transform_indices = @transform_5, window_bounds = array<i64: 4, 8, 32>}, {pipeline_mode = #tpu.pipeline_mode<synchronous>, transform_indices = @transform_6, window_bounds = array<i64: 1, 32>}, {pipeline_mode = #tpu.pipeline_mode<synchronous>, transform_indices = @transform_7, window_bounds = array<i64: 1, 32>}, {pipeline_mode = #tpu.pipeline_mode<synchronous>, transform_indices = @transform_8, window_bounds = array<i64: 1, 32>}, {pipeline_mode = #tpu.pipeline_mode<synchronous>, transform_indices = @transform_9, window_bounds = array<i64: 32, 128>}, {pipeline_mode = #tpu.pipeline_mode<synchronous>, transform_indices = @transform_10, window_bounds = array<i64: 1, 128>}, {pipeline_mode = #tpu.pipeline_mode<synchronous>, transform_indices = @transform_11, window_bounds = array<i64: 128, 32>}, {pipeline_mode = #tpu.pipeline_mode<synchronous>, transform_indices = @transform_12, window_bounds = array<i64: 1, 32>}, {transform_indices = @transform_13, window_bounds = array<i64: 1, 8, 32>}]} {
    %c0 = arith.constant 0 : index
    %c0_0 = arith.constant 0 : index
    %0 = vector.load %arg3[%c0, %c0_0] : memref<1x32xf32, #tpu.memory_space<vmem>>, vector<1x32xf32>
    %c0_1 = arith.constant 0 : index
    %c0_2 = arith.constant 0 : index
    %1 = vector.load %arg4[%c0_1, %c0_2] : memref<1x32xf32, #tpu.memory_space<vmem>>, vector<1x32xf32>
    %c0_i32 = arith.constant 0 : i32
    %2 = arith.cmpi eq, %arg1, %c0_i32 : i32
    %3 = arith.extui %2 : i1 to i32
    %c0_i32_3 = arith.constant 0 : i32
    %4 = arith.cmpi ne, %3, %c0_i32_3 : i32
    scf.if %4 {
      %c0_55 = arith.constant 0 : index
      %c0_56 = arith.constant 0 : index
      %c0_57 = arith.constant 0 : index
      %116 = vector.load %arg2[%c0_55, %c0_56, %c0_57] : memref<1x16x32xf32, #tpu.memory_space<vmem>>, vector<1x16x32xf32>
      %117 = vector.shape_cast %116 : vector<1x16x32xf32> to vector<16x32xf32>
      %cst_58 = arith.constant dense<0.000000e+00> : vector<16xf32>
      %118 = vector.multi_reduction <add>, %117, %cst_58 [1] : vector<16x32xf32> to vector<16xf32>
      %119 = vector.shape_cast %118 : vector<16xf32> to vector<16x1xf32>
      %cst_59 = arith.constant 3.200000e+01 : f32
      %120 = vector.broadcast %cst_59 : f32 to vector<16x1xf32>
      %121 = arith.divf %119, %120 : vector<16x1xf32>
      %122 = vector.broadcast %121 : vector<16x1xf32> to vector<16x32xf32>
      %123 = arith.subf %117, %122 : vector<16x32xf32>
      %124 = arith.mulf %123, %123 : vector<16x32xf32>
      %cst_60 = arith.constant dense<0.000000e+00> : vector<16xf32>
      %125 = vector.multi_reduction <add>, %124, %cst_60 [1] : vector<16x32xf32> to vector<16xf32>
      %126 = vector.shape_cast %125 : vector<16xf32> to vector<16x1xf32>
      %cst_61 = arith.constant 3.200000e+01 : f32
      %127 = vector.broadcast %cst_61 : f32 to vector<16x1xf32>
      %128 = arith.divf %126, %127 : vector<16x1xf32>
      %129 = vector.broadcast %121 : vector<16x1xf32> to vector<16x32xf32>
      %130 = arith.subf %117, %129 : vector<16x32xf32>
      %cst_62 = arith.constant 9.99999974E-6 : f32
      %131 = vector.broadcast %cst_62 : f32 to vector<16x1xf32>
      %132 = arith.addf %128, %131 : vector<16x1xf32>
      %133 = math.rsqrt %132 : vector<16x1xf32>
      %134 = vector.broadcast %133 : vector<16x1xf32> to vector<16x32xf32>
      %135 = arith.mulf %130, %134 : vector<16x32xf32>
      %136 = vector.broadcast %0 : vector<1x32xf32> to vector<16x32xf32>
      %137 = arith.mulf %135, %136 : vector<16x32xf32>
      %138 = vector.broadcast %1 : vector<1x32xf32> to vector<16x32xf32>
      %139 = arith.addf %137, %138 : vector<16x32xf32>
      %140 = arith.truncf %139 : vector<16x32xf32> to vector<16x32xbf16>
      %c0_63 = arith.constant 0 : index
      %c0_64 = arith.constant 0 : index
      %141 = vector.load %arg6[%c0_63, %c0_64] : memref<32x64xbf16, #tpu.memory_space<vmem>>, vector<32x64xbf16>
      %cst_65 = arith.constant dense<0.000000e+00> : vector<16x64xf32>
      %142 = tpu.matmul %140, %141, %cst_65 {dimension_numbers = #tpu.dot_dimension_numbers<[1], [0], [0], [1], [0, 0, 1, 1], [], []>} : vector<16x32xbf16>, vector<32x64xbf16>, vector<16x64xf32> -> vector<16x64xf32>
      %143 = vector.extract_strided_slice %142 {offsets = [0, 0], sizes = [16, 32], strides = [1, 1]} : vector<16x64xf32> to vector<16x32xf32>
      %144 = arith.truncf %143 : vector<16x32xf32> to vector<16x32xbf16>
      %145 = vector.extract_strided_slice %144 {offsets = [0, 0], sizes = [16, 8], strides = [1, 1]} : vector<16x32xbf16> to vector<16x8xbf16>
      %146 = vector.extract_strided_slice %144 {offsets = [0, 8], sizes = [16, 8], strides = [1, 1]} : vector<16x32xbf16> to vector<16x8xbf16>
      %147 = vector.extract_strided_slice %144 {offsets = [0, 16], sizes = [16, 8], strides = [1, 1]} : vector<16x32xbf16> to vector<16x8xbf16>
      %148 = vector.extract_strided_slice %144 {offsets = [0, 24], sizes = [16, 8], strides = [1, 1]} : vector<16x32xbf16> to vector<16x8xbf16>
      %149 = vector.shape_cast %145 : vector<16x8xbf16> to vector<1x16x8xbf16>
      %150 = vector.shape_cast %146 : vector<16x8xbf16> to vector<1x16x8xbf16>
      %151 = vector.shape_cast %147 : vector<16x8xbf16> to vector<1x16x8xbf16>
      %152 = vector.shape_cast %148 : vector<16x8xbf16> to vector<1x16x8xbf16>
      %153 = tpu.concatenate %149, %150, %151, %152 in 0 : vector<1x16x8xbf16>, vector<1x16x8xbf16>, vector<1x16x8xbf16>, vector<1x16x8xbf16> -> vector<4x16x8xbf16>
      %c0_66 = arith.constant 0 : index
      %c0_67 = arith.constant 0 : index
      %c0_68 = arith.constant 0 : index
      %154 = vector.load %arg16[%c0_66, %c0_67, %c0_68] : memref<4x16x8xbf16, #tpu.memory_space<vmem>>, vector<4x16x8xbf16>
      tpu.vector_store %arg16[%c0_66, %c0_67, %c0_68], %153 {strides = array<i32>} : memref<4x16x8xbf16, #tpu.memory_space<vmem>>, vector<4x16x8xbf16>,
      %155 = vector.extract_strided_slice %142 {offsets = [0, 32], sizes = [16, 32], strides = [1, 1]} : vector<16x64xf32> to vector<16x32xf32>
      %156 = arith.truncf %155 : vector<16x32xf32> to vector<16x32xbf16>
      %157 = vector.extract_strided_slice %156 {offsets = [0, 0], sizes = [16, 8], strides = [1, 1]} : vector<16x32xbf16> to vector<16x8xbf16>
      %158 = vector.extract_strided_slice %156 {offsets = [0, 8], sizes = [16, 8], strides = [1, 1]} : vector<16x32xbf16> to vector<16x8xbf16>
      %159 = vector.extract_strided_slice %156 {offsets = [0, 16], sizes = [16, 8], strides = [1, 1]} : vector<16x32xbf16> to vector<16x8xbf16>
      %160 = vector.extract_strided_slice %156 {offsets = [0, 24], sizes = [16, 8], strides = [1, 1]} : vector<16x32xbf16> to vector<16x8xbf16>
      %161 = vector.shape_cast %157 : vector<16x8xbf16> to vector<1x16x8xbf16>
      %162 = vector.shape_cast %158 : vector<16x8xbf16> to vector<1x16x8xbf16>
      %163 = vector.shape_cast %159 : vector<16x8xbf16> to vector<1x16x8xbf16>
      %164 = vector.shape_cast %160 : vector<16x8xbf16> to vector<1x16x8xbf16>
      %165 = tpu.concatenate %161, %162, %163, %164 in 0 : vector<1x16x8xbf16>, vector<1x16x8xbf16>, vector<1x16x8xbf16>, vector<1x16x8xbf16> -> vector<4x16x8xbf16>
      %c0_69 = arith.constant 0 : index
      %c0_70 = arith.constant 0 : index
      %c0_71 = arith.constant 0 : index
      %166 = vector.load %arg17[%c0_69, %c0_70, %c0_71] : memref<4x16x8xbf16, #tpu.memory_space<vmem>>, vector<4x16x8xbf16>
      tpu.vector_store %arg17[%c0_69, %c0_70, %c0_71], %165 {strides = array<i32>} : memref<4x16x8xbf16, #tpu.memory_space<vmem>>, vector<4x16x8xbf16>,
    } else {
    }
    %c8_i32 = arith.constant 8 : i32
    %5 = arith.muli %arg1, %c8_i32 : i32
    %6 = tpu.assume_multiple %5, 8 : i32
    %c0_4 = arith.constant 0 : index
    %7 = arith.index_cast %6 : i32 to index
    %c0_5 = arith.constant 0 : index
    %8 = vector.load %arg2[%c0_4, %7, %c0_5] : memref<1x16x32xf32, #tpu.memory_space<vmem>>, vector<1x8x32xf32>
    %9 = vector.shape_cast %8 : vector<1x8x32xf32> to vector<8x32xf32>
    %cst = arith.constant dense<0.000000e+00> : vector<8xf32>
    %10 = vector.multi_reduction <add>, %9, %cst [1] : vector<8x32xf32> to vector<8xf32>
    %11 = vector.shape_cast %10 : vector<8xf32> to vector<8x1xf32>
    %cst_6 = arith.constant 3.200000e+01 : f32
    %12 = vector.broadcast %cst_6 : f32 to vector<8x1xf32>
    %13 = arith.divf %11, %12 : vector<8x1xf32>
    %14 = vector.broadcast %13 : vector<8x1xf32> to vector<8x32xf32>
    %15 = arith.subf %9, %14 : vector<8x32xf32>
    %16 = arith.mulf %15, %15 : vector<8x32xf32>
    %cst_7 = arith.constant dense<0.000000e+00> : vector<8xf32>
    %17 = vector.multi_reduction <add>, %16, %cst_7 [1] : vector<8x32xf32> to vector<8xf32>
    %18 = vector.shape_cast %17 : vector<8xf32> to vector<8x1xf32>
    %cst_8 = arith.constant 3.200000e+01 : f32
    %19 = vector.broadcast %cst_8 : f32 to vector<8x1xf32>
    %20 = arith.divf %18, %19 : vector<8x1xf32>
    %21 = vector.broadcast %13 : vector<8x1xf32> to vector<8x32xf32>
    %22 = arith.subf %9, %21 : vector<8x32xf32>
    %cst_9 = arith.constant 9.99999974E-6 : f32
    %23 = vector.broadcast %cst_9 : f32 to vector<8x1xf32>
    %24 = arith.addf %20, %23 : vector<8x1xf32>
    %25 = math.rsqrt %24 : vector<8x1xf32>
    %26 = vector.broadcast %25 : vector<8x1xf32> to vector<8x32xf32>
    %27 = arith.mulf %22, %26 : vector<8x32xf32>
    %28 = vector.broadcast %0 : vector<1x32xf32> to vector<8x32xf32>
    %29 = arith.mulf %27, %28 : vector<8x32xf32>
    %30 = vector.broadcast %1 : vector<1x32xf32> to vector<8x32xf32>
    %31 = arith.addf %29, %30 : vector<8x32xf32>
    %32 = arith.truncf %31 : vector<8x32xf32> to vector<8x32xbf16>
    %c0_10 = arith.constant 0 : index
    %c0_11 = arith.constant 0 : index
    %33 = vector.load %arg5[%c0_10, %c0_11] : memref<32x32xbf16, #tpu.memory_space<vmem>>, vector<32x32xbf16>
    %cst_12 = arith.constant dense<0.000000e+00> : vector<8x32xf32>
    %34 = tpu.matmul %32, %33, %cst_12 {dimension_numbers = #tpu.dot_dimension_numbers<[1], [0], [0], [1], [0, 0, 1, 1], [], []>} : vector<8x32xbf16>, vector<32x32xbf16>, vector<8x32xf32> -> vector<8x32xf32>
    %35 = arith.truncf %34 : vector<8x32xf32> to vector<8x32xbf16>
    %36 = vector.extract_strided_slice %35 {offsets = [0, 0], sizes = [8, 8], strides = [1, 1]} : vector<8x32xbf16> to vector<8x8xbf16>
    %37 = vector.extract_strided_slice %35 {offsets = [0, 8], sizes = [8, 8], strides = [1, 1]} : vector<8x32xbf16> to vector<8x8xbf16>
    %38 = vector.extract_strided_slice %35 {offsets = [0, 16], sizes = [8, 8], strides = [1, 1]} : vector<8x32xbf16> to vector<8x8xbf16>
    %39 = vector.extract_strided_slice %35 {offsets = [0, 24], sizes = [8, 8], strides = [1, 1]} : vector<8x32xbf16> to vector<8x8xbf16>
    %40 = vector.shape_cast %36 : vector<8x8xbf16> to vector<1x8x8xbf16>
    %41 = vector.shape_cast %37 : vector<8x8xbf16> to vector<1x8x8xbf16>
    %42 = vector.shape_cast %38 : vector<8x8xbf16> to vector<1x8x8xbf16>
    %43 = vector.shape_cast %39 : vector<8x8xbf16> to vector<1x8x8xbf16>
    %44 = tpu.concatenate %40, %41, %42, %43 in 0 : vector<1x8x8xbf16>, vector<1x8x8xbf16>, vector<1x8x8xbf16>, vector<1x8x8xbf16> -> vector<4x8x8xbf16>
    %c0_13 = arith.constant 0 : index
    %c0_14 = arith.constant 0 : index
    %c0_15 = arith.constant 0 : index
    %45 = vector.load %arg16[%c0_13, %c0_14, %c0_15] : memref<4x16x8xbf16, #tpu.memory_space<vmem>>, vector<4x16x8xbf16>
    "tpu.trace_start"() <{level = 10 : i32, message = "hnd,hmd->hnm"}> : () -> ()
    %cst_16 = arith.constant dense<0.000000e+00> : vector<4x8x16xf32>
    %46 = tpu.matmul %44, %45, %cst_16 {dimension_numbers = #tpu.dot_dimension_numbers<[2], [2], [1], [1], [0, 0, 0, 1, 1, 1], [0], [0]>} : vector<4x8x8xbf16>, vector<4x16x8xbf16>, vector<4x8x16xf32> -> vector<4x8x16xf32>
    "tpu.trace_stop"() : () -> ()
    %cst_17 = arith.constant dense<0xFF800000> : vector<4x8xf32>
    %47 = vector.multi_reduction <maximumf>, %46, %cst_17 [2] : vector<4x8x16xf32> to vector<4x8xf32>
    %48 = vector.shape_cast %47 : vector<4x8xf32> to vector<4x8x1xf32>
    %49 = vector.broadcast %48 : vector<4x8x1xf32> to vector<4x8x16xf32>
    %50 = arith.subf %46, %49 : vector<4x8x16xf32>
    %51 = math.exp %50 : vector<4x8x16xf32>
    %cst_18 = arith.constant dense<0.000000e+00> : vector<4x8xf32>
    %52 = vector.multi_reduction <add>, %51, %cst_18 [2] : vector<4x8x16xf32> to vector<4x8xf32>
    %53 = vector.shape_cast %52 : vector<4x8xf32> to vector<4x8x1xf32>
    %54 = tpu.reciprocal %53 {approx = true} : vector<4x8x1xf32> -> vector<4x8x1xf32>
    %55 = arith.truncf %51 : vector<4x8x16xf32> to vector<4x8x16xbf16>
    %c0_19 = arith.constant 0 : index
    %c0_20 = arith.constant 0 : index
    %c0_21 = arith.constant 0 : index
    %56 = vector.load %arg17[%c0_19, %c0_20, %c0_21] : memref<4x16x8xbf16, #tpu.memory_space<vmem>>, vector<4x16x8xbf16>
    "tpu.trace_start"() <{level = 10 : i32, message = "hnm,hmd->hnd"}> : () -> ()
    %cst_22 = arith.constant dense<0.000000e+00> : vector<4x8x8xf32>
    %57 = tpu.matmul %55, %56, %cst_22 {dimension_numbers = #tpu.dot_dimension_numbers<[2], [1], [1], [2], [0, 0, 0, 1, 1, 2], [0], [0]>} : vector<4x8x16xbf16>, vector<4x16x8xbf16>, vector<4x8x8xf32> -> vector<4x8x8xf32>
    "tpu.trace_stop"() : () -> ()
    %58 = vector.broadcast %54 : vector<4x8x1xf32> to vector<4x8x8xf32>
    %59 = arith.mulf %57, %58 : vector<4x8x8xf32>
    %60 = arith.truncf %59 : vector<4x8x8xf32> to vector<4x8x8xbf16>
    %c0_23 = arith.constant 0 : index
    %c0_24 = arith.constant 0 : index
    %c0_25 = arith.constant 0 : index
    %61 = vector.load %arg7[%c0_23, %c0_24, %c0_25] : memref<4x8x32xbf16, #tpu.memory_space<vmem>>, vector<4x8x32xbf16>
    "tpu.trace_start"() <{level = 10 : i32, message = "hnd,hdc->hnc"}> : () -> ()
    %cst_26 = arith.constant dense<0.000000e+00> : vector<4x8x32xf32>
    %62 = tpu.matmul %60, %61, %cst_26 {dimension_numbers = #tpu.dot_dimension_numbers<[2], [1], [1], [2], [0, 0, 0, 1, 1, 2], [0], [0]>} : vector<4x8x8xbf16>, vector<4x8x32xbf16>, vector<4x8x32xf32> -> vector<4x8x32xf32>
    "tpu.trace_stop"() : () -> ()
    %cst_27 = arith.constant dense<0.000000e+00> : vector<8x32xf32>
    %63 = vector.multi_reduction <add>, %62, %cst_27 [0] : vector<4x8x32xf32> to vector<8x32xf32>
    %64 = arith.addf %9, %63 : vector<8x32xf32>
    %c0_28 = arith.constant 0 : index
    %c0_29 = arith.constant 0 : index
    %65 = vector.load %arg8[%c0_28, %c0_29] : memref<1x32xf32, #tpu.memory_space<vmem>>, vector<1x32xf32>
    %66 = vector.broadcast %65 : vector<1x32xf32> to vector<8x32xf32>
    %67 = arith.addf %64, %66 : vector<8x32xf32>
    %c0_30 = arith.constant 0 : index
    %c0_31 = arith.constant 0 : index
    %68 = vector.load %arg9[%c0_30, %c0_31] : memref<1x32xf32, #tpu.memory_space<vmem>>, vector<1x32xf32>
    %c0_32 = arith.constant 0 : index
    %c0_33 = arith.constant 0 : index
    %69 = vector.load %arg10[%c0_32, %c0_33] : memref<1x32xf32, #tpu.memory_space<vmem>>, vector<1x32xf32>
    %cst_34 = arith.constant dense<0.000000e+00> : vector<8xf32>
    %70 = vector.multi_reduction <add>, %67, %cst_34 [1] : vector<8x32xf32> to vector<8xf32>
    %71 = vector.shape_cast %70 : vector<8xf32> to vector<8x1xf32>
    %cst_35 = arith.constant 3.200000e+01 : f32
    %72 = vector.broadcast %cst_35 : f32 to vector<8x1xf32>
    %73 = arith.divf %71, %72 : vector<8x1xf32>
    %74 = vector.broadcast %73 : vector<8x1xf32> to vector<8x32xf32>
    %75 = arith.subf %67, %74 : vector<8x32xf32>
    %76 = arith.mulf %75, %75 : vector<8x32xf32>
    %cst_36 = arith.constant dense<0.000000e+00> : vector<8xf32>
    %77 = vector.multi_reduction <add>, %76, %cst_36 [1] : vector<8x32xf32> to vector<8xf32>
    %78 = vector.shape_cast %77 : vector<8xf32> to vector<8x1xf32>
    %cst_37 = arith.constant 3.200000e+01 : f32
    %79 = vector.broadcast %cst_37 : f32 to vector<8x1xf32>
    %80 = arith.divf %78, %79 : vector<8x1xf32>
    %81 = vector.broadcast %73 : vector<8x1xf32> to vector<8x32xf32>
    %82 = arith.subf %67, %81 : vector<8x32xf32>
    %cst_38 = arith.constant 9.99999974E-6 : f32
    %83 = vector.broadcast %cst_38 : f32 to vector<8x1xf32>
    %84 = arith.addf %80, %83 : vector<8x1xf32>
    %85 = math.rsqrt %84 : vector<8x1xf32>
    %86 = vector.broadcast %85 : vector<8x1xf32> to vector<8x32xf32>
    %87 = arith.mulf %82, %86 : vector<8x32xf32>
    %88 = vector.broadcast %68 : vector<1x32xf32> to vector<8x32xf32>
    %89 = arith.mulf %87, %88 : vector<8x32xf32>
    %90 = vector.broadcast %69 : vector<1x32xf32> to vector<8x32xf32>
    %91 = arith.addf %89, %90 : vector<8x32xf32>
    %92 = arith.truncf %91 : vector<8x32xf32> to vector<8x32xbf16>
    %c0_39 = arith.constant 0 : index
    %c0_40 = arith.constant 0 : index
    %93 = vector.load %arg11[%c0_39, %c0_40] : memref<32x128xbf16, #tpu.memory_space<vmem>>, vector<32x128xbf16>
    %cst_41 = arith.constant dense<0.000000e+00> : vector<8x128xf32>
    %94 = tpu.matmul %92, %93, %cst_41 {dimension_numbers = #tpu.dot_dimension_numbers<[1], [0], [0], [1], [0, 0, 1, 1], [], []>} : vector<8x32xbf16>, vector<32x128xbf16>, vector<8x128xf32> -> vector<8x128xf32>
    %c0_42 = arith.constant 0 : index
    %c0_43 = arith.constant 0 : index
    %95 = vector.load %arg12[%c0_42, %c0_43] : memref<1x128xf32, #tpu.memory_space<vmem>>, vector<1x128xf32>
    %96 = vector.broadcast %95 : vector<1x128xf32> to vector<8x128xf32>
    %97 = arith.addf %94, %96 : vector<8x128xf32>
    %cst_44 = arith.constant 5.000000e-01 : f32
    %98 = vector.broadcast %cst_44 : f32 to vector<8x128xf32>
    %99 = arith.mulf %98, %97 : vector<8x128xf32>
    %cst_45 = arith.constant 0.707106769 : f32
    %100 = vector.broadcast %cst_45 : f32 to vector<8x128xf32>
    %101 = arith.mulf %97, %100 : vector<8x128xf32>
    %102 = math.erf %101 : vector<8x128xf32>
    %cst_46 = arith.constant 1.000000e+00 : f32
    %103 = vector.broadcast %cst_46 : f32 to vector<8x128xf32>
    %104 = arith.addf %103, %102 : vector<8x128xf32>
    %105 = arith.mulf %99, %104 : vector<8x128xf32>
    %106 = arith.truncf %105 : vector<8x128xf32> to vector<8x128xbf16>
    %c0_47 = arith.constant 0 : index
    %c0_48 = arith.constant 0 : index
    %107 = vector.load %arg13[%c0_47, %c0_48] : memref<128x32xbf16, #tpu.memory_space<vmem>>, vector<128x32xbf16>
    %cst_49 = arith.constant dense<0.000000e+00> : vector<8x32xf32>
    %108 = tpu.matmul %106, %107, %cst_49 {dimension_numbers = #tpu.dot_dimension_numbers<[1], [0], [0], [1], [0, 0, 1, 1], [], []>} : vector<8x128xbf16>, vector<128x32xbf16>, vector<8x32xf32> -> vector<8x32xf32>
    %c0_50 = arith.constant 0 : index
    %c0_51 = arith.constant 0 : index
    %109 = vector.load %arg14[%c0_50, %c0_51] : memref<1x32xf32, #tpu.memory_space<vmem>>, vector<1x32xf32>
    %110 = vector.broadcast %109 : vector<1x32xf32> to vector<8x32xf32>
    %111 = arith.addf %108, %110 : vector<8x32xf32>
    %112 = arith.addf %67, %111 : vector<8x32xf32>
    %c0_52 = arith.constant 0 : index
    %c0_53 = arith.constant 0 : index
    %c0_54 = arith.constant 0 : index
    %113 = vector.load %arg15[%c0_52, %c0_53, %c0_54] : memref<1x8x32xf32, #tpu.memory_space<vmem>>, vector<1x8x32xf32>
    %114 = vector.shape_cast %113 : vector<1x8x32xf32> to vector<8x32xf32>
    %115 = vector.shape_cast %112 : vector<8x32xf32> to vector<1x8x32xf32>
    tpu.vector_store %arg15[%c0_52, %c0_53, %c0_54], %115 {strides = array<i32>} : memref<1x8x32xf32, #tpu.memory_space<vmem>>, vector<1x8x32xf32>,
    return
  }
  func.func @transform_0(%arg0: i32, %arg1: i32) -> (i32, i32, i32) {
    %c0_i32 = arith.constant 0 : i32
    %c0_i32_0 = arith.constant 0 : i32
    %c0_i32_1 = arith.constant 0 : i32
    return %arg0, %c0_i32, %c0_i32_0 : i32, i32, i32
  }
  func.func @transform_1(%arg0: i32, %arg1: i32) -> (i32, i32) {
    %c0_i32 = arith.constant 0 : i32
    %c0_i32_0 = arith.constant 0 : i32
    %c0_i32_1 = arith.constant 0 : i32
    return %c0_i32, %c0_i32_0 : i32, i32
  }
  func.func @transform_2(%arg0: i32, %arg1: i32) -> (i32, i32) {
    %c0_i32 = arith.constant 0 : i32
    %c0_i32_0 = arith.constant 0 : i32
    %c0_i32_1 = arith.constant 0 : i32
    return %c0_i32, %c0_i32_0 : i32, i32
  }
  func.func @transform_3(%arg0: i32, %arg1: i32) -> (i32, i32) {
    %c0_i32 = arith.constant 0 : i32
    %c0_i32_0 = arith.constant 0 : i32
    %c0_i32_1 = arith.constant 0 : i32
    return %c0_i32, %c0_i32_0 : i32, i32
  }
  func.func @transform_4(%arg0: i32, %arg1: i32) -> (i32, i32) {
    %c0_i32 = arith.constant 0 : i32
    %c0_i32_0 = arith.constant 0 : i32
    %c0_i32_1 = arith.constant 0 : i32
    return %c0_i32, %c0_i32_0 : i32, i32
  }
  func.func @transform_5(%arg0: i32, %arg1: i32) -> (i32, i32, i32) {
    %c0_i32 = arith.constant 0 : i32
    %c0_i32_0 = arith.constant 0 : i32
    %c0_i32_1 = arith.constant 0 : i32
    %c0_i32_2 = arith.constant 0 : i32
    return %c0_i32, %c0_i32_0, %c0_i32_1 : i32, i32, i32
  }
  func.func @transform_6(%arg0: i32, %arg1: i32) -> (i32, i32) {
    %c0_i32 = arith.constant 0 : i32
    %c0_i32_0 = arith.constant 0 : i32
    %c0_i32_1 = arith.constant 0 : i32
    return %c0_i32, %c0_i32_0 : i32, i32
  }
  func.func @transform_7(%arg0: i32, %arg1: i32) -> (i32, i32) {
    %c0_i32 = arith.constant 0 : i32
    %c0_i32_0 = arith.constant 0 : i32
    %c0_i32_1 = arith.constant 0 : i32
    return %c0_i32, %c0_i32_0 : i32, i32
  }
  func.func @transform_8(%arg0: i32, %arg1: i32) -> (i32, i32) {
    %c0_i32 = arith.constant 0 : i32
    %c0_i32_0 = arith.constant 0 : i32
    %c0_i32_1 = arith.constant 0 : i32
    return %c0_i32, %c0_i32_0 : i32, i32
  }
  func.func @transform_9(%arg0: i32, %arg1: i32) -> (i32, i32) {
    %c0_i32 = arith.constant 0 : i32
    %c0_i32_0 = arith.constant 0 : i32
    %c0_i32_1 = arith.constant 0 : i32
    return %c0_i32, %c0_i32_0 : i32, i32
  }
  func.func @transform_10(%arg0: i32, %arg1: i32) -> (i32, i32) {
    %c0_i32 = arith.constant 0 : i32
    %c0_i32_0 = arith.constant 0 : i32
    %c0_i32_1 = arith.constant 0 : i32
    return %c0_i32, %c0_i32_0 : i32, i32
  }
  func.func @transform_11(%arg0: i32, %arg1: i32) -> (i32, i32) {
    %c0_i32 = arith.constant 0 : i32
    %c0_i32_0 = arith.constant 0 : i32
    %c0_i32_1 = arith.constant 0 : i32
    return %c0_i32, %c0_i32_0 : i32, i32
  }
  func.func @transform_12(%arg0: i32, %arg1: i32) -> (i32, i32) {
    %c0_i32 = arith.constant 0 : i32
    %c0_i32_0 = arith.constant 0 : i32
    %c0_i32_1 = arith.constant 0 : i32
    return %c0_i32, %c0_i32_0 : i32, i32
  }
  func.func @transform_13(%arg0: i32, %arg1: i32) -> (i32, i32, i32) {
    %c0_i32 = arith.constant 0 : i32
    %c0_i32_0 = arith.constant 0 : i32
    return %arg0, %arg1, %c0_i32 : i32, i32, i32
  }
}

</mosaic_0001>

<bundles_post_ra>
// kernel: tpu_custom_call.1
= control target key start
LH: loop header
LB: loop body
LE: loop exit
PB: predicated region body
PF: predicated region fallthrough
CT: control target
= control target key end

     0   :  { %s2988_s0 = inlined_call_operand.vmem [shape: f32[2,16,32], index: 0, kind: input, shape index: {}]   ;;  %s2989_s1 = inlined_call_operand.hbm [shape: f32[1,32], index: 1, kind: input, shape index: {}]   ;;  %s2990_s2 = inlined_call_operand.hbm [shape: f32[1,32], index: 2, kind: input, shape index: {}]   ;;  %s2991_s3 = inlined_call_operand.vmem [shape: bf16[32,32], index: 3, kind: input, shape index: {}]   ;;  %s2992_s4 = inlined_call_operand.vmem [shape: bf16[32,64], index: 4, kind: input, shape index: {}]   ;;  %s2993_s5 = inlined_call_operand.vmem [shape: bf16[4,8,32], index: 5, kind: input, shape index: {}]   ;;  %s2994_s6 = inlined_call_operand.hbm [shape: f32[1,32], index: 6, kind: input, shape index: {}]   ;;  %s2995_s7 = inlined_call_operand.hbm [shape: f32[1,32], index: 7, kind: input, shape index: {}]   ;;  %s2996_s8 = inlined_call_operand.hbm [shape: f32[1,32], index: 8, kind: input, shape index: {}]   ;;  %s2997_s9 = inlined_call_operand.vmem [shape: bf16[32,128], index: 9, kind: input, shape index: {}]   ;;  %s2998_s10 = inlined_call_operand.vmem [shape: f32[1,128], index: 10, kind: input, shape index: {}]   ;;  %s2999_s11 = inlined_call_operand.vmem [shape: bf16[128,32], index: 11, kind: input, shape index: {}]   ;;  %s3000_s12 = inlined_call_operand.vmem [shape: f32[1,32], index: 12, kind: input, shape index: {}]   ;;  %s3001_s13 = inlined_call_operand.hbm [shape: f32[2,16,32], index: 13, kind: output, shape index: {}]  }
   0x1   :  { %3013 = sst [smem:[#allocation26_spill]] %s2990_s2 }
   0x2   :  { %3014 = sst [smem:[#allocation27_spill]] %s3001_s13 }
   0x3   :  { %18 = vsyncpa [#allocation5], 0 }
   0x4   :  { %19 = vsyncpa [#allocation8], 0 }
   0x5   :  { %20 = vsyncpa [#allocation11], 0 }
   0x6   :  { %21 = vsyncpa [#allocation6], 0 }
   0x7   :  { %23 = vsyncpa [#allocation6 + $0x1], 0  ;;  %s2573_s25 = smov 0   ;;  %s2575_s26 = smov 0  }
   0x8   :  { %s2577_s27 = smov 0   ;;  %s2579_s28 = smov 0  }
   0x9   :  { %s2581_s29 = smov 0   ;;  %s2583_s30 = smov 0  }
   0xa   :  { %s2585_s14 = smov 0   ;;  %s2587_s15 = smov 0  }
   0xb LB: > { %3015 = sst [smem:[#allocation18_spill]] %s2456_s25  ;;  %s1833_s16 = sadd.s32 4294967295, %s2484_s15   ;;  %s2484_s15 = sphi %s2587_s15, %s29_s15   ;;  %s2480_s14 = sphi %s2585_s14, %s3041_s14   ;;  %s2476_s30 = sphi %s2583_s30, %s3040_s30   ;;  %s2472_s29 = sphi %s2581_s29, %s3039_s29   ;;  %s2468_s28 = sphi %s2579_s28, %s3038_s28   ;;  %s2464_s27 = sphi %s2577_s27, %s3037_s27   ;;  %s2460_s26 = sphi %s2575_s26, %s3043_s26   ;;  %s2456_s25 = sphi %s2573_s25, %s3042_s25  }
   0xc   : > { %3016 = sst [smem:[#allocation19_spill]] %s2464_s27  ;;  %s1834_s17 = sadd.s32 4294967294, %s2484_s15  }
   0xd   : > { %3017 = sst [smem:[#allocation20_spill]] %s2476_s30  ;;  %s38_s18 = sadd.s32 1, %s2476_s30 }
   0xe   : > { %3018 = sst [smem:[#allocation21_spill]] %s2480_s14  ;;  %s41_s19 = sadd.s32 1, %s2480_s14 }
   0xf   : > { %p39_p0 = scmp.ge.s32.totalorder %s38_s18, 2  ;;  %s328_s20 = sadd.s32 1, %s2464_s27 }
  0x10   : > { %p338_p1 = scmp.ne.s32.totalorder %s2464_s27, %s2460_s26  ;;  %p339_p2 = scmp.eq.s32.totalorder %s1833_s16, 3 }
  0x11   : > { %s3045_s18 = smov (%p39_p0, %s38_s18), 0  ;;  %s3047_s19 = smov (!%p39_p0, %s41_s19), %s2480_s14 }
  0x12   : > { %3019 = sst [smem:[#allocation22_spill]] %s3045_s18  ;;  %s324_s21 = ssub.s32 %s2476_s30, %s3045_s18 }
  0x13   : > { %p2625_p3 = por %p339_p2, %p338_p1  ;;  %p43_p4 = scmp.ge.s32.totalorder %s3047_s19, 2 }
  0x14   : > { %p344_p5 = scmp.ne.s32.totalorder %s2460_s26, %s2456_s25  ;;  %p345_p6 = scmp.eq.s32.totalorder %s1834_s17, 3 }
  0x15   : > { %s3020_s22 = scalar_select %p2625_p3, 1, 0 }
  0x16   : > { %p1835_p7 = scmp.ge.s32.totalorder %s2484_s15, 1  ;;  %s3049_s19 = smov (%p43_p4, %s3047_s19), 0 }
  0x17   : > { %3021 = sst [smem:[#allocation23_spill]] %s3049_s19  ;;  %p2634_p8 = por %p345_p6, %p344_p5 }
  0x18   : > { %p352_p9 = scmp.lt.s32.totalorder %s2484_s15, 5  ;;  %s323_s24 = ssub.s32 %s2480_s14, %s3049_s19 }
  0x19   : > { %s3022_s23 = scalar_select %p2634_p8, 1, 0 }
  0x1a   : > { %s325_s13 = sor.u32 %s324_s21, %s323_s24  ;;  %p2641_p10 = pnand %p1835_p7, %p352_p9 }
  0x1b   : > { %3023 = sst [smem:[#allocation24_spill]] %s3022_s23  ;;  %p326_p11 = scmp.eq.s32.totalorder %s325_s13, 0 }
  0x1c   : > { %p2645_p12 = scmp.eq.s32.totalorder %s1833_s16, 0  ;;  %p2091_p13 = pneg %p2641_p10 }
  0x1d   : > { %s2652_s17 = scalar_select %p326_p11, %s2464_s27, %s328_s20  }
  0x1e   : > { %s3025_s30 = scalar_select %p2645_p12, 1, 0 }
  0x1f   : > { %3026 = sst [smem:[#allocation25_spill]] %s2652_s17  ;;  %p2656_p0 = pnand %p2645_p12, %p2091_p13 }
  0x20   : > { %s2486_s21 = smov [#allocation7]   ;;  %s2487_s19 = smov [#allocation10]  }
  0x21   : > { %s376_s24 = sshll.u32 %s2486_s21, 4  ;;  %s407_s13 = sshll.u32 %s2487_s19, 4  ;;  %s377_s24 = int_to_ptr.vmem [resolvable:$true] %s376_s24  ;;  %s408_s13 = int_to_ptr.vmem [resolvable:$true] %s407_s13 }
  0x22   : > { %p2662_p1 = pneg %p2656_p0  ;;  %s2261_s14 = scalar_lea.vmem %s377_s24, 16 }
  0x23   : > { %p2262_p2 = scmp.ne.s32.totalorder %s377_s24, %s2261_s14  ;;  %s2268_s20 = scalar_lea.vmem %s377_s24, 32 }
  0x24   : > { %p2269_p6 = scmp.lt.s32.totalorder %s377_s24, %s377_s24  ;;  %p2270_p7 = scmp.lt.s32.totalorder %s2268_s20, %s2261_s14 }
  0x25   : > { %p2264_p4 = pnand %p2262_p2, %p2662_p1 }
  0x26   : > { %p2271_p9 = por %p2270_p7, %p2269_p6 }
  0x27   : > { %p2265_p5 = pneg %p2264_p4 }
  0x29   : > { %p2272_p11 = pnand %p2271_p9, %p2265_p5 }
  0x2b   : > { %2275 = shalt.err (!%p2272_p11)
}
  0x2c   : > { %s3029_s2 = sld [smem:[#allocation26_spill]]  ;;  %s2287_s17 = scalar_lea.vmem %s408_s13, 16 }
  0x2d   : > { %p2288_p13 = scmp.ne.s32.totalorder %s408_s13, %s2287_s17  ;;  %s2294_s27 = scalar_lea.vmem %s408_s13, 32 }
  0x2e   : > { %p2295_p4 = scmp.lt.s32.totalorder %s408_s13, %s408_s13  ;;  %p2296_p3 = scmp.lt.s32.totalorder %s2294_s27, %s2287_s17 }
  0x2f   : > { %p2290_p8 = pnand %p2288_p13, %p2662_p1 }
  0x30   : > { %p2297_p12 = por %p2296_p3, %p2295_p4 }
  0x31   : > { %p2291_p2 = pneg %p2290_p8 }
  0x32   : > { %2097 = dma.hbm_to_vmem [thread:$0]  (!%p2656_p0), %s3029_s2, 16, %s377_s24, [#allocation8]  }
  0x33   : > { %p2298_p6 = pnand %p2297_p12, %p2291_p2 }
  0x35   : > { %2301 = shalt.err (!%p2298_p6)
}
  0x36   : > { %2103 = dma.hbm_to_vmem [thread:$0]  (!%p2656_p0), %s2995_s7, 16, %s408_s13, [#allocation11]  }
  0x37   : > { %s2488_s24 = smov [#allocation4]   ;;  %s2489_s21 = smov [#allocation9]  }
  0x38   : > { %s365_s19 = sshll.u32 %s2488_s24, 4  ;;  %s396_s2 = sshll.u32 %s2489_s21, 4  ;;  %s366_s19 = int_to_ptr.vmem [resolvable:$true] %s365_s19  ;;  %s397_s2 = int_to_ptr.vmem [resolvable:$true] %s396_s2 }
  0x39   : > { %s2313_s25 = scalar_lea.vmem %s366_s19, 16  ;;  %s2320_s27 = scalar_lea.vmem %s366_s19, 32 }
  0x3a   : > { %p2314_p8 = scmp.ne.s32.totalorder %s366_s19, %s2313_s25  ;;  %p2321_p3 = scmp.lt.s32.totalorder %s366_s19, %s366_s19 }
  0x3b   : > { %p2322_p12 = scmp.lt.s32.totalorder %s2320_s27, %s2313_s25 }
  0x3c   : > { %p2316_p5 = pnand %p2314_p8, %p2662_p1 }
  0x3d   : > { %p2323_p9 = por %p2322_p12, %p2321_p3 }
  0x3e   : > { %p2317_p7 = pneg %p2316_p5 }
  0x40   : > { %p2324_p11 = pnand %p2323_p9, %p2317_p7 }
  0x42   : > { %2327 = shalt.err (!%p2324_p11)
}
  0x43   : > { %2094 = dma.hbm_to_vmem [thread:$0]  (!%p2656_p0), %s2989_s1, 16, %s366_s19, [#allocation5]  }
  0x44   : > { %s2339_s14 = scalar_lea.vmem %s397_s2, 16  ;;  %s2346_s20 = scalar_lea.vmem %s397_s2, 32 }
  0x45   : > { %p2340_p13 = scmp.ne.s32.totalorder %s397_s2, %s2339_s14  ;;  %p2347_p6 = scmp.lt.s32.totalorder %s397_s2, %s397_s2 }
  0x46   : > { %p2348_p8 = scmp.lt.s32.totalorder %s2346_s20, %s2339_s14 }
  0x47   : > { %p2342_p2 = pnand %p2340_p13, %p2662_p1 }
  0x48   : > { %p2349_p5 = por %p2348_p8, %p2347_p6 }
  0x49   : > { %p2343_p4 = pneg %p2342_p2 }
  0x4b   : > { %p2350_p3 = pnand %p2349_p5, %p2343_p4 }
  0x4d   : > { %2353 = shalt.err (!%p2350_p3)
}
  0x4e   : > { %2100 = dma.hbm_to_vmem [thread:$0]  (!%p2656_p0), %s2994_s6, 16, %s397_s2, [#allocation8]  }
  0x4f   : > { %s2490_s19 = smov [#allocation12]  }
  0x50   : > { %s418_s21 = sshll.u32 %s2490_s19, 4  ;;  %s419_s21 = int_to_ptr.vmem [resolvable:$true] %s418_s21 }
  0x51   : > { %s2365_s27 = scalar_lea.vmem %s419_s21, 16  ;;  %s2372_s17 = scalar_lea.vmem %s419_s21, 32 }
  0x52   : > { %p2366_p7 = scmp.ne.s32.totalorder %s419_s21, %s2365_s27  ;;  %p2373_p11 = scmp.lt.s32.totalorder %s419_s21, %s419_s21 }
  0x53   : > { %p2374_p13 = scmp.lt.s32.totalorder %s2372_s17, %s2365_s27 }
  0x54   : > { %p2368_p12 = pnand %p2366_p7, %p2662_p1 }
  0x55   : > { %p2375_p2 = por %p2374_p13, %p2373_p11 }
  0x56   : > { %p2369_p9 = pneg %p2368_p12 }
  0x58   : > { %p2376_p4 = pnand %p2375_p2, %p2369_p9 }
  0x5a   : > { %2379 = shalt.err (!%p2376_p4)
}
  0x5b   : > { %2106 = dma.hbm_to_vmem [thread:$0]  (!%p2656_p0), %s2996_s8, 16, %s419_s21, [#allocation11]  }
  0x5c   : > { %451 = sbr.rel (%p2641_p10) target bundleno = 2987 (0xbab), region = 72  ;;  %p3030_p6 = scmp.ne.s32.totalorder (!%p2641_p10), %s3025_s30, 0 }
  0x61   : > { %2439 = dma.done.wait (%p3030_p6), [#allocation5], 16  }
  0x62   : > { %2441 = vsyncadd (%p3030_p6), [#allocation5], 4294967280 }
  0x63   : > { %2443 = dma.done.wait (%p3030_p6), [#allocation8], 32  }
  0x64   : > { %2445 = vsyncadd (%p3030_p6), [#allocation8], 4294967264 }
  0x65   : > { %2447 = dma.done.wait (%p3030_p6), [#allocation11], 32  }
  0x66   : > { %2449 = vsyncadd (%p3030_p6), [#allocation11], 4294967264  ;;  %s508_s2 = sand.u32 1, %s2460_s26   ;;  %p511_p10 = scmp.lt.s32.totalorder %s2472_s29, 1  ;;  %v2727_v0 = vld [vmem:[#allocation4] sm:$0x1] }
  0x67   : > { %s2719_s18 = sshll.u32 %s508_s2, 3  ;;  %v2729_v1 = vld [vmem:[#allocation7] sm:$0x1]  ;;  %p1851_p0 = scmp.ne.s32.totalorder %s2468_s28, 0 }
  0x68   : > { %s512_s23 = scalar_select %p511_p10, %s2472_s29, 1 }
  0x69   : > { %s510_s30 = scalar_lea.vmem [#allocation13], %s2719_s18  ;;  %522 = sbr.rel (%p1851_p0) target bundleno = 865 (0x361), region = 96 }
  0x6a   : > { %s1908_s16 = sshll.u32 %s512_s23, 4  ;;  %s2493_s13 = smov (!%p1851_p0), 112  }
  0x6b   : > { %s2725_s24 = scalar_lea.vmem %s2988_s0, %s1908_s16  ;;  %s2494_s14 = smov (!%p1851_p0), 120  }
  0x6c   : > { %s2495_s23 = smov (!%p1851_p0), 104   ;;  %s2496_s16 = smov (!%p1851_p0), 96  }
  0x6e   : > { %v523_v2 = vld [vmem:[%s2725_s24] sm:$0xff]  ;;  %vm525_vm0 = vcmask 261120   ;;  %v524_v3 = vld [vmem:[%s2725_s24 + $0x8] sm:$0xff]  ;;  %v2491_v17 = vmov 0.0   ;;  %vm2492_vm1 = vmmov 0   ;;  %v554_v25 = vlaneseq }
  0x6f   : > { %v526_v4 = vsel %vm525_vm0, %v523_v2, 0.0  ;;  %v529_v5 = vsel %vm525_vm0, %v524_v3, 0.0  ;;  %v2202_v16 = vld [vmem:[%s2992_s4 + $0x8] sm:$0xff]   ;;  %1953 = vmatprep.subr.bf16.mxu0 %v2491_v17  ;;  %1957 = vmatprep.mubr.msk.bf16.mxu0 %vm2492_vm1, %v2491_v17  ;;  %v2203_v18 = vld [vmem:[%s2992_s4] sm:$0xff]   ;;  %vm662_vm2 = vcmask 60416  }
  0x70   : > { %527 = vadd.xlane.f32.xlu0 %v526_v4  ;;  %1954 = vmatpush3.bf16.msra.mxu0 %v2202_v16  ;;  %v555_v26 = vshrl.u32 %v554_v25, 7 }
  0x71   : > { %1955 = vmatprep.subr.bf16.mxu0 %v2491_v17 }
  0x72   : > { %v556_v27 = vsub.s32 0, %v555_v26 }
  0x74   : > { %530 = vadd.xlane.f32.xlu0 %v529_v5  ;;  %1956 = vmatpush3.bf16.msra.mxu0 %v2203_v18  ;;  %v557_v30 = vrot.slane %v2727_v0, %v556_v27  ;;  %v565_v34 = vrot.slane %v2729_v1, %v556_v27 }
  0xf9   : > { %v528_v6 = vpop.xlane.xlu0 %527 }
  0xfa   : > { %v533_v7 = vmul.f32 0.03125, %v528_v6 }
  0xfc   : > { %v535_v8 = vsub.f32 %v523_v2, %v533_v7 }
  0xfd   : > { %v531_v9 = vpop.xlane.xlu0 %530 }
  0xfe   : > { %v534_v10 = vmul.f32 0.03125, %v531_v9  ;;  %v537_v11 = vmul.f32 %v535_v8, %v535_v8 }
 0x100   : > { %v536_v12 = vsub.f32 %v524_v3, %v534_v10  ;;  %v539_v13 = vsel %vm525_vm0, %v537_v11, 0.0 }
 0x101   : > { %540 = vadd.xlane.f32.xlu1 %v539_v13 }
 0x102   : > { %v538_v14 = vmul.f32 %v536_v12, %v536_v12 }
 0x104   : > { %v542_v15 = vsel %vm525_vm0, %v538_v14, 0.0 }
 0x105   : > { %543 = vadd.xlane.f32.xlu1 %v542_v15 }
 0x18a   : > { %v541_v19 = vpop.xlane.xlu1 %540 }
 0x18b   : > { %v545_v20 = vmul.f32 0.03125, %v541_v19 }
 0x18d   : > { %v547_v21 = vadd.f32 1e-05, %v545_v20 }
 0x18e   : > { %v544_v22 = vpop.xlane.xlu1 %543 }
 0x18f   : > { %2204 = vrsqrt.f32 %v547_v21  ;;  %v546_v23 = vmul.f32 0.03125, %v544_v22 }
 0x191   : > { %v548_v24 = vadd.f32 1e-05, %v546_v23 }
 0x193   : > { %2206 = vrsqrt.f32 %v548_v24 }
 0x19c   : > { %v2205_v28 = vpop.eup %2204 }
 0x19d   : > { %v551_v29 = vmul.f32 %v2205_v28, %v535_v8 }
 0x19f   : > { %v559_v33 = vmul.f32 %v557_v30, %v551_v29 }
 0x1a0   : > { %v2207_v31 = vpop.eup %2206 }
 0x1a1   : > { %v552_v32 = vmul.f32 %v2207_v31, %v536_v12  ;;  %v567_v36 = vadd.f32 %v565_v34, %v559_v33 }
 0x1a3   : > { %v560_v35 = vmul.f32 %v557_v30, %v552_v32 }
 0x1a5   : > { %v568_v37 = vadd.f32 %v565_v34, %v560_v35 }
 0x1a7   : > { %v569_v38 = vpack.c.bf16 %v568_v37, %v567_v36 }
 0x1a9   : > { %1958 = vmatmul.mubr.msk.bf16.vlgmr.msra.gmra.mxu0 %vm525_vm0, %v569_v38 }
 0x269   : > { %v623_v39 = vpop.f32.mrf.mxu0 }
 0x26a   : > { %v1909_v40 = vpack.c.bf16 %v623_v39, %v623_v39 }
 0x26b   : > { %v1959_v41 = vpop.f32.mrf.mxu0 }
 0x26c   : > { %663 = vst.msk [vmem:[#allocation2] sm:$0xf] %vm662_vm2, %v1909_v40 }
 0x26d   : > { %v626_v42 = vpop.f32.mrf.mxu0 }
 0x26e   : > { %v630_v43 = vpack.c.bf16 %v626_v42, %v623_v39  ;;  %v1910_v44 = vpack.c.bf16 %v626_v42, %v626_v42 }
 0x26f   : > { %v1960_v45 = vpop.f32.mrf.mxu0 }
 0x270   : > { %664 = vst.msk [vmem:[#allocation2 + $0x4] sm:$0xf] %vm662_vm2, %v1910_v44  ;;  %634 = vrot.lane.b32.xlu1 %v630_v43, %s2493_s13  ;;  %632 = vrot.lane.b32.xlu0 %v630_v43, %s2494_s14 }
 0x274   : > { %636 = vrot.lane.b32.xlu1 %v630_v43, %s2495_s23  ;;  %673 = vrot.lane.b32.xlu0 %v1910_v44, %s2496_s16 }
 0x278   : > { %671 = vrot.lane.b32.xlu1 %v1909_v40, %s2496_s16 }
 0x2e2   : > { %v635_v46 = vpop.permute.xlu1 %634  ;;  %v633_v47 = vpop.permute.xlu0 %632 }
 0x2e3   : > { %v1859_v48 = vcombine.low %v635_v46, %v635_v46  ;;  %v1860_v49 = vcombine.high %v635_v46, %v635_v46  ;;  %v1857_v50 = vcombine.low %v633_v47, %v633_v47  ;;  %v1858_v51 = vcombine.high %v633_v47, %v633_v47 }
 0x2e5   : > { %667 = vst.msk [vmem:[#allocation2 + $0x10] sm:$0xf] %vm662_vm2, %v1859_v48  ;;  %668 = vst.msk [vmem:[#allocation2 + $0x14] sm:$0xf] %vm662_vm2, %v1860_v49  ;;  %677 = vrot.lane.b32.xlu0 %v1858_v51, %s2496_s16  ;;  %675 = vrot.lane.b32.xlu1 %v1857_v50, %s2496_s16 }
 0x2e6   : > { %665 = vst.msk [vmem:[#allocation2 + $0x8] sm:$0xf] %vm662_vm2, %v1857_v50  ;;  %666 = vst.msk [vmem:[#allocation2 + $0xc] sm:$0xf] %vm662_vm2, %v1858_v51  ;;  %v637_v52 = vpop.permute.xlu1 %636  ;;  %v674_v53 = vpop.permute.xlu0 %673 }
 0x2e7   : > { %v1861_v54 = vcombine.low %v637_v52, %v637_v52  ;;  %v1862_v55 = vcombine.high %v637_v52, %v637_v52  ;;  %696 = vst.msk [vmem:[#allocation3 + $0x4] sm:$0xf] %vm662_vm2, %v674_v53 }
 0x2e9   : > { %669 = vst.msk [vmem:[#allocation2 + $0x18] sm:$0xf] %vm662_vm2, %v1861_v54  ;;  %670 = vst.msk [vmem:[#allocation2 + $0x1c] sm:$0xf] %vm662_vm2, %v1862_v55  ;;  %681 = vrot.lane.b32.xlu0 %v1860_v49, %s2496_s16  ;;  %679 = vrot.lane.b32.xlu1 %v1859_v48, %s2496_s16 }
 0x2ea   : > { %v672_v56 = vpop.permute.xlu1 %671 }
 0x2eb   : > { %695 = vst.msk [vmem:[#allocation3] sm:$0xf] %vm662_vm2, %v672_v56 }
 0x2ed   : > { %685 = vrot.lane.b32.xlu0 %v1862_v55, %s2496_s16  ;;  %683 = vrot.lane.b32.xlu1 %v1861_v54, %s2496_s16 }
 0x357   : > { %v676_v57 = vpop.permute.xlu1 %675  ;;  %v678_v58 = vpop.permute.xlu0 %677 }
 0x358   : > { %697 = vst.msk [vmem:[#allocation3 + $0x8] sm:$0xf] %vm662_vm2, %v676_v57  ;;  %698 = vst.msk [vmem:[#allocation3 + $0xc] sm:$0xf] %vm662_vm2, %v678_v58 }
 0x35b   : > { %v680_v59 = vpop.permute.xlu1 %679  ;;  %v682_v60 = vpop.permute.xlu0 %681 }
 0x35c   : > { %699 = vst.msk [vmem:[#allocation3 + $0x10] sm:$0xf] %vm662_vm2, %v680_v59  ;;  %700 = vst.msk [vmem:[#allocation3 + $0x14] sm:$0xf] %vm662_vm2, %v682_v60 }
 0x35f   : > { %v684_v61 = vpop.permute.xlu1 %683  ;;  %v686_v62 = vpop.permute.xlu0 %685 }
 0x360   : > { %701 = vst.msk [vmem:[#allocation3 + $0x18] sm:$0xf] %vm662_vm2, %v684_v61  ;;  %702 = vst.msk [vmem:[#allocation3 + $0x1c] sm:$0xf] %vm662_vm2, %v686_v62 }
 0x361 PF: > { %s1863_s20 = sshll.u32 %s2468_s28, 3  ;;  %vm706_vm3 = vcmask 261120   ;;  %v2208_v8 = vld [vmem:[%s2991_s3 + $0x8] sm:$0xff]   ;;  %v2497_v9 = vmov 0.0   ;;  %vm2498_vm4 = vmmov 0   ;;  %v2209_v10 = vld [vmem:[%s2991_s3] sm:$0xff]   ;;  %v722_v14 = vlaneseq }
 0x362   : > { %s704_s25 = scalar_lea.vmem %s2725_s24, %s1863_s20  ;;  %1961 = vmatprep.subr.bf16.mxu1 %v2497_v9  ;;  %1965 = vmatprep.mubr.msk.bf16.mxu1 %vm2498_vm4, %v2497_v9  ;;  %v2210_v22 = vld [vmem:[#allocation2] sm:$0xff]   ;;  %vm816_vm5 = vcmask 64512   ;;  %s2499_s17 = smov 104   ;;  %v2213_v33 = vld [vmem:[#allocation2 + $0x10] sm:$0xff]   ;;  %vm1016_vm6 = vcmask 130048   ;;  %v2215_v62 = vld [vmem:[#allocation3 + $0x8] sm:$0xff]  }
 0x363   : > { %v2766_v63 = vld [vmem:[%s704_s25] sm:$0xff]  ;;  %1962 = vmatpush3.bf16.msra.mxu1 %v2208_v8  ;;  %1987 = vmatprep.subr.bf16.mxu0 %v2497_v9  ;;  %v723_v15 = vshrl.u32 %v722_v14, 7  ;;  %v821_v25 = vsel %vm816_vm5, %v2210_v22, 0  ;;  %s2500_s13 = smov 120   ;;  %s2501_s14 = smov 112   ;;  %v923_v34 = vsel %vm816_vm5, %v2213_v33, 0 }
 0x364   : > { %v707_v2 = vsel %vm706_vm3, %v2766_v63, 0.0  ;;  %1963 = vmatprep.subr.bf16.mxu1 %v2497_v9  ;;  %1989 = vmatprep.mubr.msk.bf16.mxu0 %vm2498_vm4, %v2497_v9  ;;  %v2214_v43 = vld [vmem:[#allocation3] sm:$0xff]   ;;  %vm1280_vm7 = vcmask 1043456   ;;  %s1709_s20 = sshll.u32 %s510_s30, 4  ;;  %s3031_s21 = sld [smem:[#allocation27_spill]]  ;;  %s2933_s20 = int_to_ptr.vmem [resolvable:$true] %s1709_s20 }
 0x365   : > { %708 = vadd.xlane.f32.xlu0 %v707_v2  ;;  %v724_v16 = vsub.s32 0, %v723_v15  ;;  %p3032_p8 = scmp.ne.s32.totalorder %s3020_s22, 0  ;;  %s2502_s27 = smov [#allocation13]  }
 0x367   : > { %1964 = vmatpush3.bf16.msra.mxu1 %v2209_v10  ;;  %v725_v17 = vrot.slane %v2727_v0, %v724_v16  ;;  %v732_v20 = vrot.slane %v2729_v1, %v724_v16  ;;  %v2212_v0 = vld [vmem:[#allocation2 + $0x18] sm:$0xff]   ;;  %v2211_v1 = vld [vmem:[#allocation2 + $0x8] sm:$0xff]  }
 0x368   : > { %1969 = vmatprep.subr.bf16.mxu1 %v2497_v9  ;;  %v974_v26 = vsel %vm816_vm5, %v2212_v0, 0  ;;  %v872_v30 = vsel %vm816_vm5, %v2211_v1, 0 }
 0x369   : > { %1988 = vmatpush3.bf16.xpose.msra.mxu0 %v974_v26 }
 0x36a   : > { %1999 = vmatprep.subr.bf16.mxu0 %v2497_v9 }
 0x3ee   : > { %v709_v3 = vpop.xlane.xlu0 %708 }
 0x3ef   : > { %v711_v4 = vmul.f32 0.03125, %v709_v3  ;;  %v2216_v3 = vld [vmem:[#allocation3 + $0x10] sm:$0xff]  }
 0x3f1   : > { %v712_v5 = vsub.f32 %v2766_v63, %v711_v4 }
 0x3f3   : > { %v713_v6 = vmul.f32 %v712_v5, %v712_v5 }
 0x3f5   : > { %v714_v7 = vsel %vm706_vm3, %v713_v6, 0.0 }
 0x3f6   : > { %715 = vadd.xlane.f32.xlu0 %v714_v7 }
 0x47f   : > { %v716_v11 = vpop.xlane.xlu0 %715 }
 0x480   : > { %v717_v12 = vmul.f32 0.03125, %v716_v11 }
 0x482   : > { %v718_v13 = vadd.f32 1e-05, %v717_v12 }
 0x484   : > { %2228 = vrsqrt.f32 %v718_v13 }
 0x491   : > { %v2229_v18 = vpop.eup %2228 }
 0x492   : > { %v720_v19 = vmul.f32 %v2229_v18, %v712_v5 }
 0x494   : > { %v727_v21 = vmul.f32 %v725_v17, %v720_v19  ;;  %v2217_v17 = vld [vmem:[#allocation3 + $0x18] sm:$0xff]  }
 0x496   : > { %v734_v23 = vadd.f32 %v732_v20, %v727_v21  ;;  %v1273_v20 = vld [vmem:[%s2993_s5] sm:$0xf] }
 0x498   : > { %v735_v24 = vpack.c.bf16 %v734_v23, %v734_v23 }
 0x49a   : > { %1966 = vmatmul.mubr.msk.bf16.vlgmr.msra.gmra.mxu1 %vm706_vm3, %v735_v24  ;;  %v1282_v24 = vsel %vm1280_vm7, %v1273_v20, 0 }
 0x49b   : > { %1970 = vmatpush3.bf16.xpose.msra.mxu1 %v821_v25  ;;  %1971 = vmatprep.mubr.msk.bf16.mxu1 %vm2498_vm4, %v2497_v9 }
 0x49c   : > { %1975 = vmatprep.subr.bf16.mxu1 %v2497_v9 }
 0x55a   : > { %v789_v27 = vpop.f32.mrf.mxu1 }
 0x55b   : > { %v795_v28 = vpack.c.bf16 %v789_v27, %v789_v27  ;;  %v1274_v27 = vld [vmem:[%s2993_s5 + $0x4] sm:$0xf] }
 0x55c   : > { %v1967_v29 = vpop.f32.mrf.mxu1 }
 0x55d   : > { %801 = vrot.lane.b32.xlu0 %v795_v28, %s2499_s17  ;;  %797 = vrot.lane.b32.xlu1 %v795_v28, %s2500_s13  ;;  %s1904_s17 = sshll.u32 %s2472_s29, 1  ;;  %s2380_s29 = scalar_lea.vmem %s2933_s20, 128 }
 0x55e   : > { %1972 = vmatmul.mubr.msk.bf16.vlgmr.msra.gmra.mxu1 %vm816_vm5, %v795_v28  ;;  %v792_v31 = vpop.f32.mrf.mxu1  ;;  %s1705_s13 = sadd.s32 %s2468_s28, %s1904_s17  ;;  %s1694_s28 = scalar_lea.sflag [#allocation6], %s508_s2 }
 0x55f   : > { %1976 = vmatpush3.bf16.xpose.msra.mxu1 %v872_v30  ;;  %1977 = vmatprep.mubr.msk.bf16.mxu1 %vm2498_vm4, %v2497_v9  ;;  %v1275_v31 = vld [vmem:[%s2993_s5 + $0x8] sm:$0xf]  ;;  %s1905_s16 = sshll.u32 %s1705_s13, 7  ;;  %p2381_p1 = scmp.ne.s32.totalorder %s2933_s20, %s2380_s29 }
 0x560   : > { %v1968_v32 = vpop.f32.mrf.mxu1  ;;  %1981 = vmatprep.subr.bf16.mxu1 %v2497_v9  ;;  %s2931_s24 = scalar_lea.hbm %s3031_s21, %s1905_s16  ;;  %s2384_s17 = sshll.u32 %s2502_s27, 4  ;;  %s2385_s17 = int_to_ptr.vmem [resolvable:$false] %s2384_s17 }
 0x561   : > { %799 = vrot.lane.b32.xlu1 %v795_v28, %s2501_s14  ;;  %v1328_v28 = vsel %vm1280_vm7, %v1274_v27, 0  ;;  %p2382_p5 = pnand %p2381_p1, %p3032_p8  ;;  %s2386_s13 = scalar_lea.vmem %s2385_s17, 256 }
 0x562   : > { %p2387_p7 = scmp.lt.s32.totalorder %s2933_s20, %s2385_s17  ;;  %p2388_p12 = scmp.lt.s32.totalorder %s2386_s13, %s2380_s29 }
 0x563   : > { %p2383_p3 = pneg %p2382_p5 }
 0x564   : > { %p2389_p9 = por %p2388_p12, %p2387_p7 }
 0x566   : > { %p2390_p11 = pnand %p2389_p9, %p2383_p3 }
 0x5cf   : > { %v802_v35 = vpop.permute.xlu0 %801  ;;  %v798_v36 = vpop.permute.xlu1 %797 }
 0x5d0   : > { %1978 = vmatmul.mubr.msk.bf16.vlgmr.msra.gmra.mxu1 %vm816_vm5, %v798_v36  ;;  %1990 = vmatmul.mubr.msk.bf16.vlgmr.msra.gmra.mxu0 %vm816_vm5, %v802_v35  ;;  %v1374_v35 = vsel %vm1280_vm7, %v1275_v31, 0 }
 0x5d1   : > { %1982 = vmatpush3.bf16.xpose.msra.mxu1 %v923_v34  ;;  %1983 = vmatprep.mubr.msk.bf16.mxu1 %vm2498_vm4, %v2497_v9 }
 0x5d2   : > { %1993 = vmatprep.subr.bf16.mxu1 %v2497_v9  ;;  %2001 = vmatprep.mubr.msk.bf16.mxu0 %vm2498_vm4, %v2497_v9 }
 0x5d3   : > { %v800_v37 = vpop.permute.xlu1 %799  ;;  %2000 = vmatpush3.bf16.msra.mxu0 %v2215_v62 }
 0x5d4   : > { %2011 = vmatprep.subr.bf16.mxu0 %v2497_v9 }
 0x5d8   : > { %1984 = vmatmul.mubr.msk.bf16.vlgmr.msra.gmra.mxu1 %vm816_vm5, %v800_v37 }
 0x5d9   : > { %1995 = vmatprep.mubr.msk.bf16.mxu1 %vm2498_vm4, %v2497_v9  ;;  %1994 = vmatpush3.bf16.msra.mxu1 %v2214_v43  ;;  %v1276_v43 = vld [vmem:[%s2993_s5 + $0xc] sm:$0xf] }
 0x5da   : > { %2005 = vmatprep.subr.bf16.mxu1 %v2497_v9 }
 0x61e   : > { %v857_v38 = vpop.f32.mrf.mxu1 }
 0x61f   : > { %v1017_v39 = vsel %vm1016_vm6, %v857_v38, -inf }
 0x620   : > { %1018 = vmax.xlane.f32.xlu1 %v1017_v39  ;;  %v1973_v40 = vpop.f32.mrf.mxu1 }
 0x622   : > { %v860_v41 = vpop.f32.mrf.mxu1 }
 0x624   : > { %v1974_v42 = vpop.f32.mrf.mxu1 }
 0x690   : > { %v908_v44 = vpop.f32.mrf.mxu1  ;;  %v1010_v45 = vpop.f32.mrf.mxu0 }
 0x691   : > { %v1020_v46 = vsel %vm1016_vm6, %v908_v44, -inf  ;;  %v1026_v57 = vsel %vm1016_vm6, %v1010_v45, -inf }
 0x692   : > { %v1991_v47 = vpop.f32.mrf.mxu0  ;;  %1021 = vmax.xlane.f32.xlu0 %v1020_v46  ;;  %v1979_v48 = vpop.f32.mrf.mxu1 }
 0x693   : > { %v1420_v47 = vsel %vm1280_vm7, %v1276_v43, 0  ;;  %v1889_v43 = vld [vmem:[#allocation12] ss:$0 sm:$0xff] }
 0x694   : > { %v911_v49 = vpop.f32.mrf.mxu1  ;;  %v1013_v50 = vpop.f32.mrf.mxu0 }
 0x696   : > { %v1980_v51 = vpop.f32.mrf.mxu1  ;;  %v1992_v52 = vpop.f32.mrf.mxu0 }
 0x698   : > { %v959_v53 = vpop.f32.mrf.mxu1 }
 0x699   : > { %v1023_v54 = vsel %vm1016_vm6, %v959_v53, -inf }
 0x69a   : > { %1024 = vmax.xlane.f32.xlu1 %v1023_v54  ;;  %v1985_v55 = vpop.f32.mrf.mxu1 }
 0x69c   : > { %v962_v56 = vpop.f32.mrf.mxu1 }
 0x69e   : > { %1027 = vmax.xlane.f32.xlu1 %v1026_v57  ;;  %v1986_v58 = vpop.f32.mrf.mxu1 }
 0x6a9   : > { %v1019_v59 = vpop.xlane.xlu1 %1018 }
 0x6aa   : > { %v1029_v60 = vsub.f32 %v857_v38, %v1019_v59 }
 0x6ac   : > { %v1033_v61 = vmul.f32 1.442695, %v1029_v60 }
 0x6ae   : > { %2230 = vpow2.f32 %v1033_v61 }
 0x6bb   : > { %v2231_v2 = vpop.eup %2230 }
 0x6bc   : > { %v1041_v4 = vsel %vm1016_vm6, %v2231_v2, 0.0  ;;  %v1057_v5 = vpack.c.bf16 %v2231_v2, %v2231_v2 }
 0x6bd   : > { %1042 = vadd.xlane.f32.xlu1 %v1041_v4 }
 0x6be   : > { %1996 = vmatmul.mubr.msk.bf16.vlgmr.msra.gmra.mxu1 %vm1016_vm6, %v1057_v5 }
 0x6bf   : > { %2006 = vmatpush3.bf16.msra.mxu1 %v2216_v3  ;;  %2007 = vmatprep.mubr.msk.bf16.mxu1 %vm2498_vm4, %v2497_v9 }
 0x6c0   : > { %2017 = vmatprep.subr.bf16.mxu1 %v2497_v9 }
 0x71b   : > { %v1022_v6 = vpop.xlane.xlu0 %1021 }
 0x71c   : > { %v1030_v7 = vsub.f32 %v908_v44, %v1022_v6 }
 0x71e   : > { %v1035_v8 = vmul.f32 1.442695, %v1030_v7 }
 0x720   : > { %2232 = vpow2.f32 %v1035_v8 }
 0x723   : > { %v1025_v10 = vpop.xlane.xlu1 %1024 }
 0x724   : > { %v1031_v11 = vsub.f32 %v959_v53, %v1025_v10 }
 0x726   : > { %v1037_v12 = vmul.f32 1.442695, %v1031_v11 }
 0x727   : > { %v1028_v13 = vpop.xlane.xlu1 %1027 }
 0x728   : > { %2234 = vpow2.f32 %v1037_v12  ;;  %v1032_v14 = vsub.f32 %v1010_v45, %v1028_v13 }
 0x72a   : > { %v1039_v15 = vmul.f32 1.442695, %v1032_v14 }
 0x72c   : > { %2236 = vpow2.f32 %v1039_v15 }
 0x72d   : > { %v2233_v16 = vpop.eup %2232 }
 0x72e   : > { %v1044_v18 = vsel %vm1016_vm6, %v2233_v16, 0.0  ;;  %v1058_v19 = vpack.c.bf16 %v2233_v16, %v2233_v16 }
 0x72f   : > { %1045 = vadd.xlane.f32.xlu1 %v1044_v18 }
 0x730   : > { %2002 = vmatmul.mubr.msk.bf16.vlgmr.msra.gmra.mxu0 %vm1016_vm6, %v1058_v19 }
 0x731   : > { %2012 = vmatpush3.bf16.msra.mxu0 %v2217_v17  ;;  %2013 = vmatprep.mubr.msk.bf16.mxu0 %vm2498_vm4, %v2497_v9 }
 0x732   : > { %2023 = vmatprep.subr.bf16.mxu0 %v2497_v9 }
 0x735   : > { %v2235_v21 = vpop.eup %2234 }
 0x736   : > { %v1047_v22 = vsel %vm1016_vm6, %v2235_v21, 0.0  ;;  %v1059_v23 = vpack.c.bf16 %v2235_v21, %v2235_v21 }
 0x737   : > { %1048 = vadd.xlane.f32.xlu1 %v1047_v22 }
 0x738   : > { %2008 = vmatmul.mubr.msk.bf16.vlgmr.msra.gmra.mxu1 %vm1016_vm6, %v1059_v23 }
 0x739   : > { %v2237_v25 = vpop.eup %2236  ;;  %2018 = vmatpush3.bf16.msra.mxu1 %v1282_v24  ;;  %2019 = vmatprep.mubr.msk.bf16.mxu1 %vm2498_vm4, %v2497_v9 }
 0x73a   : > { %v1050_v0 = vsel %vm1016_vm6, %v2237_v25, 0.0  ;;  %v1060_v26 = vpack.c.bf16 %v2237_v25, %v2237_v25  ;;  %2029 = vmatprep.subr.bf16.mxu1 %v2497_v9  ;;  %v1887_v25 = vld [vmem:[#allocation9] ss:$0 sm:$0xff] }
 0x73b   : > { %1051 = vadd.xlane.f32.xlu0 %v1050_v0 }
 0x73c   : > { %2014 = vmatmul.mubr.msk.bf16.vlgmr.msra.gmra.mxu0 %vm1016_vm6, %v1060_v26 }
 0x73d   : > { %2025 = vmatprep.mubr.msk.bf16.mxu0 %vm2498_vm4, %v2497_v9  ;;  %2024 = vmatpush3.bf16.msra.mxu0 %v1328_v28 }
 0x73e   : > { %2035 = vmatprep.subr.bf16.mxu0 %v2497_v9 }
 0x746   : > { %v1043_v1 = vpop.xlane.xlu1 %1042 }
 0x747   : > { %2238 = vrcp.f32 %v1043_v1 }
 0x754   : > { %v2239_v29 = vpop.eup %2238 }
 0x77e   : > { %v1112_v30 = vpop.f32.mrf.mxu1 }
 0x77f   : > { %v1265_v32 = vmul.f32 %v2239_v29, %v1112_v30 }
 0x780   : > { %v1997_v33 = vpop.f32.mrf.mxu1 }
 0x781   : > { %v1269_v34 = vpack.c.bf16 %v1265_v32, %v1265_v32 }
 0x782   : > { %v1115_v36 = vpop.f32.mrf.mxu1 }
 0x783   : > { %2020 = vmatmul.mubr.msk.bf16.vlgmr.msra.gmra.mxu1 %vm816_vm5, %v1269_v34  ;;  %v2219_v34 = vld [vmem:[%s2997_s9] sm:$0xff]   ;;  %v2221_v36 = vld [vmem:[%s2999_s11 + $0x30] sm:$0xff]  }
 0x784   : > { %v1998_v37 = vpop.f32.mrf.mxu1  ;;  %2030 = vmatpush3.bf16.msra.mxu1 %v1374_v35  ;;  %2031 = vmatprep.mubr.msk.bf16.mxu1 %vm2498_vm4, %v2497_v9  ;;  %v2220_v35 = vld [vmem:[%s2999_s11 + $0x38] sm:$0xff]  }
 0x785   : > { %2041 = vmatprep.subr.bf16.mxu1 %v2497_v9 }
 0x7b8   : > { %v1046_v38 = vpop.xlane.xlu1 %1045 }
 0x7b9   : > { %2240 = vrcp.f32 %v1046_v38 }
 0x7c0   : > { %v1049_v39 = vpop.xlane.xlu1 %1048 }
 0x7c1   : > { %2242 = vrcp.f32 %v1049_v39 }
 0x7c4   : > { %v1052_v40 = vpop.xlane.xlu0 %1051 }
 0x7c5   : > { %2244 = vrcp.f32 %v1052_v40 }
 0x7c6   : > { %v2241_v41 = vpop.eup %2240 }
 0x7ce   : > { %v2243_v50 = vpop.eup %2242 }
 0x7d2   : > { %v2245_v55 = vpop.eup %2244 }
 0x7f0   : > { %v1161_v42 = vpop.f32.mrf.mxu0 }
 0x7f1   : > { %v1266_v44 = vmul.f32 %v2241_v41, %v1161_v42  ;;  %v1888_v41 = vld [vmem:[#allocation10] ss:$0 sm:$0xff] }
 0x7f2   : > { %v2003_v45 = vpop.f32.mrf.mxu0 }
 0x7f3   : > { %v1270_v46 = vpack.c.bf16 %v1266_v44, %v1266_v44 }
 0x7f4   : > { %v1164_v48 = vpop.f32.mrf.mxu0 }
 0x7f5   : > { %2026 = vmatmul.mubr.msk.bf16.vlgmr.msra.gmra.mxu0 %vm816_vm5, %v1270_v46  ;;  %v2223_v48 = vld [vmem:[%s2999_s11 + $0x20] sm:$0xff]  }
 0x7f6   : > { %v2004_v49 = vpop.f32.mrf.mxu0  ;;  %2036 = vmatpush3.bf16.msra.mxu0 %v1420_v47  ;;  %2037 = vmatprep.mubr.msk.bf16.mxu0 %vm2498_vm4, %v2497_v9  ;;  %v2222_v47 = vld [vmem:[%s2999_s11 + $0x28] sm:$0xff]  }
 0x7f7   : > { %2049 = vmatprep.subr.bf16.mxu0 %v2497_v9  ;;  %v2224_v49 = vld [vmem:[%s2999_s11 + $0x18] sm:$0xff]  }
 0x7f8   : > { %v1210_v51 = vpop.f32.mrf.mxu1 }
 0x7f9   : > { %v1267_v52 = vmul.f32 %v2243_v50, %v1210_v51  ;;  %v2225_v50 = vld [vmem:[%s2999_s11 + $0x10] sm:$0xff]   ;;  %v2226_v51 = vld [vmem:[%s2999_s11 + $0x8] sm:$0xff]  }
 0x7fa   : > { %v2009_v53 = vpop.f32.mrf.mxu1 }
 0x7fb   : > { %v1271_v54 = vpack.c.bf16 %v1267_v52, %v1267_v52  ;;  %v2227_v52 = vld [vmem:[%s2999_s11] sm:$0xff]  }
 0x7fc   : > { %v1213_v56 = vpop.f32.mrf.mxu1  ;;  %v1259_v57 = vpop.f32.mrf.mxu0  ;;  %v1890_v53 = vld [vmem:[%s2998_s10] ss:$0 sm:$0xff] }
 0x7fd   : > { %v1268_v58 = vmul.f32 %v2245_v55, %v1259_v57  ;;  %2032 = vmatmul.mubr.msk.bf16.vlgmr.msra.gmra.mxu1 %vm816_vm5, %v1271_v54 }
 0x7fe   : > { %v2010_v59 = vpop.f32.mrf.mxu1  ;;  %v2015_v60 = vpop.f32.mrf.mxu0  ;;  %2045 = vmatprep.mubr.msk.bf16.mxu1 %vm2498_vm4, %v2497_v9 }
 0x7ff   : > { %v1272_v61 = vpack.c.bf16 %v1268_v58, %v1268_v58 }
 0x800   : > { %v1262_v62 = vpop.f32.mrf.mxu0 }
 0x801   : > { %2038 = vmatmul.mubr.msk.bf16.vlgmr.msra.gmra.mxu0 %vm816_vm5, %v1272_v61 }
 0x802   : > { %v2016_v2 = vpop.f32.mrf.mxu0  ;;  %2065 = vmatprep.mubr.msk.bf16.mxu0 %vm2498_vm4, %v2497_v9  ;;  %2050 = vmatpush3.bf16.msra.mxu0 %v2220_v35 }
 0x803   : > { %2051 = vmatprep.subr.bf16.mxu0 %v2497_v9 }
 0x806   : > { %2052 = vmatpush3.bf16.msra.mxu0 %v2221_v36 }
 0x807   : > { %2053 = vmatprep.subr.bf16.mxu0 %v2497_v9 }
 0x80a   : > { %2054 = vmatpush3.bf16.msra.mxu0 %v2222_v47 }
 0x80b   : > { %2055 = vmatprep.subr.bf16.mxu0 %v2497_v9 }
 0x80e   : > { %2056 = vmatpush3.bf16.msra.mxu0 %v2223_v48 }
 0x80f   : > { %2057 = vmatprep.subr.bf16.mxu0 %v2497_v9 }
 0x812   : > { %2058 = vmatpush3.bf16.msra.mxu0 %v2224_v49 }
 0x813   : > { %2059 = vmatprep.subr.bf16.mxu0 %v2497_v9 }
 0x816   : > { %2060 = vmatpush3.bf16.msra.mxu0 %v2225_v50 }
 0x817   : > { %2061 = vmatprep.subr.bf16.mxu0 %v2497_v9 }
 0x81a   : > { %2062 = vmatpush3.bf16.msra.mxu0 %v2226_v51 }
 0x81b   : > { %2063 = vmatprep.subr.bf16.mxu0 %v2497_v9 }
 0x81e   : > { %2064 = vmatpush3.bf16.msra.mxu0 %v2227_v52 }
 0x843   : > { %v1318_v3 = vpop.f32.mrf.mxu1 }
 0x844   : > { %v1462_v14 = vsel %vm706_vm3, %v1318_v3, 0.0  ;;  %v1894_v3 = vld [vmem:[%s3000_s12] ss:$0 sm:$0xff] }
 0x845   : > { %v2021_v4 = vpop.f32.mrf.mxu1 }
 0x847   : > { %v1321_v5 = vpop.f32.mrf.mxu1 }
 0x849   : > { %v2022_v6 = vpop.f32.mrf.mxu1 }
 0x8b5   : > { %v1364_v7 = vpop.f32.mrf.mxu0 }
 0x8b6   : > { %v1463_v12 = vsel %vm706_vm3, %v1364_v7, 0.0 }
 0x8b7   : > { %v2027_v8 = vpop.f32.mrf.mxu0  ;;  %v1464_v16 = vadd.f32 %v1463_v12, %v1462_v14 }
 0x8b9   : > { %v1367_v10 = vpop.f32.mrf.mxu0 }
 0x8bb   : > { %v2028_v11 = vpop.f32.mrf.mxu0 }
 0x8bd   : > { %v1410_v13 = vpop.f32.mrf.mxu1 }
 0x8be   : > { %v1465_v15 = vsel %vm706_vm3, %v1410_v13, 0.0 }
 0x8bf   : > { %v2033_v17 = vpop.f32.mrf.mxu1  ;;  %v1466_v18 = vadd.f32 %v1465_v15, %v1464_v16 }
 0x8c1   : > { %v1413_v19 = vpop.f32.mrf.mxu1  ;;  %v1456_v20 = vpop.f32.mrf.mxu0 }
 0x8c2   : > { %v1467_v21 = vsel %vm706_vm3, %v1456_v20, 0.0 }
 0x8c3   : > { %v1468_v22 = vadd.f32 %v1467_v21, %v1466_v18  ;;  %v2034_v23 = vpop.f32.mrf.mxu1  ;;  %v2039_v24 = vpop.f32.mrf.mxu0 }
 0x8c5   : > { %v1469_v0 = vadd.f32 %v1468_v22, %v2766_v63  ;;  %v1459_v26 = vpop.f32.mrf.mxu0  ;;  %v2218_v63 = vld [vmem:[%s2997_s9 + $0x8] sm:$0xff]  }
 0x8c6   : > { %2042 = vmatpush3.bf16.msra.mxu1 %v2218_v63 }
 0x8c7   : > { %v2040_v1 = vpop.f32.mrf.mxu0  ;;  %v2872_v27 = vadd.f32 %v1887_v25, %v1469_v0  ;;  %2043 = vmatprep.subr.bf16.mxu1 %v2497_v9 }
 0x8c9   : > { %v1480_v28 = vsel %vm706_vm3, %v2872_v27, 0.0 }
 0x8ca   : > { %1481 = vadd.xlane.f32.xlu1 %v1480_v28  ;;  %2044 = vmatpush3.bf16.msra.mxu1 %v2219_v34 }
 0x953   : > { %v1482_v29 = vpop.xlane.xlu1 %1481 }
 0x954   : > { %v1483_v30 = vmul.f32 0.03125, %v1482_v29 }
 0x956   : > { %v1484_v31 = vsub.f32 %v2872_v27, %v1483_v30 }
 0x958   : > { %v1485_v32 = vmul.f32 %v1484_v31, %v1484_v31 }
 0x95a   : > { %v1486_v33 = vsel %vm706_vm3, %v1485_v32, 0.0 }
 0x95b   : > { %1487 = vadd.xlane.f32.xlu0 %v1486_v33 }
 0x9e4   : > { %v1488_v37 = vpop.xlane.xlu0 %1487 }
 0x9e5   : > { %v1489_v38 = vmul.f32 0.03125, %v1488_v37 }
 0x9e7   : > { %v1490_v39 = vadd.f32 1e-05, %v1489_v38 }
 0x9e9   : > { %2246 = vrsqrt.f32 %v1490_v39 }
 0x9f6   : > { %v2247_v40 = vpop.eup %2246 }
 0x9f7   : > { %v1492_v42 = vmul.f32 %v2247_v40, %v1484_v31 }
 0x9f9   : > { %v1499_v44 = vmul.f32 %v1888_v41, %v1492_v42 }
 0x9fb   : > { %v1506_v45 = vadd.f32 %v1889_v43, %v1499_v44 }
 0x9fd   : > { %v1507_v46 = vpack.c.bf16 %v1506_v45, %v1506_v45 }
 0x9ff   : > { %2046 = vmatmul.mubr.msk.bf16.vlgmr.msra.gmra.mxu1 %vm706_vm3, %v1507_v46 }
 0xabf   : > { %v1568_v54 = vpop.f32.mrf.mxu1 }
 0xac0   : > { %v1569_v55 = vadd.f32 %v1890_v53, %v1568_v54 }
 0xac1   : > { %v2047_v56 = vpop.f32.mrf.mxu1 }
 0xac2   : > { %v1575_v57 = vmul.f32 0.70710677, %v1569_v55  ;;  %v1574_v60 = vmul.f32 0.5, %v1569_v55 }
 0xac3   : > { %v1571_v58 = vpop.f32.mrf.mxu1 }
 0xac4   : > { %2248 = verf.f32 %v1575_v57 }
 0xac5   : > { %v2048_v59 = vpop.f32.mrf.mxu1 }
 0xad1   : > { %v2249_v9 = vpop.eup %2248 }
 0xad2   : > { %v1577_v61 = vadd.f32 1.0, %v2249_v9 }
 0xad4   : > { %v1578_v62 = vmul.f32 %v1577_v61, %v1574_v60 }
 0xad6   : > { %v1579_v2 = vpack.c.bf16 %v1578_v62, %v1578_v62 }
 0xad8   : > { %2066 = vmatmul.mubr.bf16.vlgmr.msra.gmra.mxu0 %v1579_v2 }
 0xb98   : > { %v1685_v4 = vpop.f32.mrf.mxu0 }
 0xb99   : > { %v1686_v5 = vadd.f32 %v1894_v3, %v1685_v4 }
 0xb9a   : > { %v2067_v6 = vpop.f32.mrf.mxu0 }
 0xb9b   : > { %v1691_v7 = vadd.f32 %v1686_v5, %v2872_v27 }
 0xb9c   : > { %v1688_v8 = vpop.f32.mrf.mxu0 }
 0xb9d   : > { %1692 = vst.msk [vmem:[%s510_s30] sm:$0xff] %vm706_vm3, %v1691_v7 }
 0xb9e   : > { %v2068_v10 = vpop.f32.mrf.mxu0 }
 0xb9f   : > { %2393 = shalt.err (!%p2390_p11)
}
 0xba0   : > { %s2394_s18 = scalar_lea.hbm %s2931_s24, 128  ;;  %s2398_s14 = scalar_lea.hbm %s3031_s21, 512 }
 0xba1   : > { %p2395_p13 = scmp.ne.s32.totalorder %s2931_s24, %s2394_s18  ;;  %p2399_p6 = scmp.lt.s32.totalorder %s2931_s24, %s3031_s21 }
 0xba2   : > { %p2400_p10 = scmp.lt.s32.totalorder %s2398_s14, %s2394_s18 }
 0xba3   : > { %p2396_p2 = pnand %p2395_p13, %p3032_p8 }
 0xba4   : > { %p2401_p0 = por %p2400_p10, %p2399_p6 }
 0xba5   : > { %p2397_p4 = pneg %p2396_p2 }
 0xba7   : > { %p2402_p1 = pnand %p2401_p0, %p2397_p4 }
 0xba9   : > { %2405 = shalt.err (!%p2402_p1)
}
 0xbaa   : > { %2089 = dma.vmem_to_hbm [thread:$0]  (%p3032_p8), %s2933_s20, 128, %s2931_s24, %s1694_s28  }
 0xbab PF: > { %s3033_s25 = sld [smem:[#allocation18_spill]]  ;;  %p2121_p5 = scmp.ge.s32.totalorder %s2484_s15, 2 }
 0xbac   : > { %s3034_s19 = sld [smem:[#allocation24_spill]] }
 0xbb1   : > { %s1721_s29 = sand.u32 1, %s3033_s25  }
 0xbb2   : > { %p3035_p3 = scmp.ne.s32.totalorder %s3034_s19, 0  ;;  %s1722_s27 = scalar_lea.sflag [#allocation6], %s1721_s29 }
 0xbb4   : > { %p2108_p7 = pnand %p2121_p5, %p3035_p3 }
 0xbb6   : > { %p2109_p12 = pneg %p2108_p7 }
 0xbb8   : > { %2451 = dma.done.wait (%p2109_p12), %s1722_s27, 128  }
 0xbb9   : > { %2453 = vsyncadd (%p2109_p12), %s1722_s27, 4294967168  ;;  %s29_s15 = sadd.s32 1, %s2484_s15   ;;  %s3036_s22 = sld [smem:[#allocation19_spill]] }
 0xbba   : > { %p26_p9 = scmp.ge.s32.totalorder %s29_s15, 6   ;;  %s3037_s27 = sld [smem:[#allocation25_spill]] }
 0xbbb   : > { %s3038_s28 = sld [smem:[#allocation20_spill]]  ;;  %s3042_s25 = smov %s2460_s26 }
 0xbbc   : > { %s3039_s29 = sld [smem:[#allocation21_spill]]  ;;  %28 = sbr.rel (!%p26_p9) target bundleno = 11 (0xb), region = 133 }
 0xbbd   : > { %s3040_s30 = sld [smem:[#allocation22_spill]] }
 0xbbe   : > { %s3041_s14 = sld [smem:[#allocation23_spill]] }
 0xbbf   : > { %s3043_s26 = smov %s3036_s22 }
 0xbc1   :  { %1727 = vsyncpa [#allocation5], 1 }
 0xbc2   :  { %1729 = vsyncpa [#allocation5 + $0x1], 1 }
 0xbc3   :  { %1730 = vsyncpa [#allocation8], 1 }
 0xbc4   :  { %1731 = vsyncpa [#allocation11], 1 }
 0xbc5   :  { %1732 = vsyncpa [#allocation6], 1 }
 0xbc6   :  { %1734 = vsyncpa [#allocation6 + $0x1], 1 }

</bundles_post_ra>
